<compile_context>
chip_gen: v7x
topology: tpu7x:2x2x1
jax: 0.10.0
libtpu: 0.0.40
codegen_flags: <defaults>
</compile_context>

<pallas_src>
import functools

import jax
import jax.numpy as jnp
from jax.experimental import pallas as pl
from jax.experimental.pallas import tpu as pltpu


def _round_up(x, m):
    return (x + m - 1) // m * m


def _vmem_capacity_bytes():
    try:
        return int(pltpu.get_tpu_info().vmem_capacity_bytes)
    except Exception:
        return 64 << 20  # conservative default (v7x per-core VMEM)


def _estimate_vmem(th, wp, cins, coutp, ktot, out_itemsize, t_steps):
    """Working-set estimate incl. in-kernel temporaries (review item 6)."""
    lout = th * wp
    total = 0
    for cin in cins:
        total += 2 * cin * (lout + 4 * wp) * 2              # dbl-buffered main+halo (bf16)
        total += cin * ((th + 4) + 2 * (th + 2)) * wp * 2   # chunk concat + 2 dx-shifted copies
    total += 2 * coutp * lout * out_itemsize                # dbl-buffered output block
    total += 2 * (coutp * ktot * 2 + coutp * 4)             # resident weights + bias
    total += ktot * lout * 2                                # stacked-K RHS (bf16)
    total += 2 * coutp * lout * 4                           # fp32 dot result + epilogue temp
    if t_steps > 1:
        total += coutp * lout * 4                           # resident fp32 accumulator
    return total


def _pick_tile_rows(h, wp, cins, coutp, ktot, out_itemsize, t_steps, budget):
    """Largest TH (multiple of 8, <= ceil8(H)) whose working set fits budget."""
    h8 = _round_up(h, 8)
    best = 8
    th = 8
    while th <= h8:
        if _estimate_vmem(th, wp, cins, coutp, ktot, out_itemsize, t_steps) <= budget:
            best = th
        th += 8
    return min(best, h8)


# ----------------------------------------------------------------------------
# Pallas kernel: fused multi-input 3x3 "same" conv + bias + ReLU (+ time mean).
#
# Layout: each zero-padded frame (Cin, H_in_pad, Wp) with Wp a multiple of 128
# is flattened row-major.  A grid step (n, r, t) sees a TH-row "main" block and
# a 4-row lane-aligned "halo" block of the same array; their concatenation is
# the (TH+4)-row window needed by the 3x3 conv.  dy tap offsets are multiples
# of Wp (lane-aligned, free); the dx in {1,2} shifts are two lane-rotated
# copies made once per input and reused across dy.  All 9*n_in tap slices are
# stacked into a single (Ktot, TH*Wp) RHS and contracted with the prepacked
# (Coutp, Ktot) weights in one MXU matmul with fp32 accumulation; bias + ReLU
# run in fp32, and the result is either written directly (T == 1) or averaged
# over the innermost t axis through a resident fp32 scratch (encoder).
# ----------------------------------------------------------------------------
def _make_conv_kernel(n_in, wp, th, t_steps):
    lsh = (th + 2) * wp        # length of each dx-shifted copy
    lout = th * wp             # flat length of the output chunk

    def kernel(*refs):
        mains = refs[:n_in]
        halos = refs[n_in:2 * n_in]
        w_ref = refs[2 * n_in]
        b_ref = refs[2 * n_in + 1]
        o_ref = refs[2 * n_in + 2]
        acc_ref = refs[2 * n_in + 3] if t_steps > 1 else None

        pieces = []
        for i in range(n_in):
            main = mains[i][0, 0]                              # (Cin_i, TH*Wp)  bf16
            halo = halos[i][0, 0]                              # (Cin_i, 4*Wp)   bf16
            chunk = jnp.concatenate([main, halo], axis=-1)     # (Cin_i, (TH+4)*Wp)
            # dx lane shifts: dx=0 aligned, dx=1/2 are the only lane rotates.
            shifted = [chunk[:, dx:dx + lsh] for dx in range(3)]
            for dy in range(3):
                base = dy * wp                                 # multiple of 128 -> aligned
                for dx in range(3):
                    pieces.append(shifted[dx][:, base:base + lout])

        rhs = jnp.concatenate(pieces, axis=0)                  # (Ktot, TH*Wp) bf16
        out = jnp.dot(w_ref[...], rhs, preferred_element_type=jnp.float32)
        out = jnp.maximum(out + b_ref[...], 0.0)               # bias + ReLU (fp32)

        if t_steps == 1:
            o_ref[0] = out.astype(o_ref.dtype)
        else:
            t = pl.program_id(2)

            @pl.when(t == 0)
            def _():
                acc_ref[...] = jnp.zeros_like(acc_ref)

            acc_ref[...] += out

            @pl.when(t == t_steps - 1)
            def _():
                o_ref[0] = (acc_ref[...] * (1.0 / t_steps)).astype(o_ref.dtype)

    return kernel


def conv3x3_relu_fused(xs, ws, bias, *, out_dtype=jnp.float32, w_crop=None):
    """Fused 3x3 'same' conv + bias + ReLU, averaged over the time axis.

    xs : list of (N_i, T_i, Cin_i, H, W) arrays sharing (H, W); N_i in {1, N}
         and T_i in {1, T} are broadcast through the BlockSpec index_maps.
    ws : list of (Cout, Cin_i, 3, 3) weights; per-input contributions summed.
    bias : (Cout,).
    Returns mean over T of relu(conv(x_t) + bias), shape (N, Cout, H, crop_w).
    """
    assert len(xs) == len(ws) >= 1
    H, W = xs[0].shape[3], xs[0].shape[4]
    N = max(x.shape[0] for x in xs)
    T = max(x.shape[1] for x in xs)
    Cout = ws[0].shape[0]
    n_in = len(xs)
    cins = [x.shape[2] for x in xs]

    out_itemsize = jnp.dtype(out_dtype).itemsize
    coutp = _round_up(Cout, 16 if out_itemsize == 2 else 8)   # unmasked sublane stores
    ktot = 9 * sum(cins)
    wp = _round_up(W + 2, 128)                                # row-padded width (lane-aligned)

    # generation-aware VMEM budget: ~38 MiB working set on 64 MiB parts (v7x),
    # ~80 MiB on 128 MiB parts (v5e / v6e).
    cap = _vmem_capacity_bytes()
    limit_cap = (100 << 20) if cap >= (128 << 20) else (48 << 20)
    budget = int(0.8 * limit_cap)
    th = _pick_tile_rows(H, wp, cins, coutp, ktot, out_itemsize, T, budget)
    n_chunks = -(-H // th)
    h_out_pad = n_chunks * th
    h_in_pad = h_out_pad + 4                                  # room for the 4-row halo block
    flat_in = h_in_pad * wp
    lout = th * wp

    need = _estimate_vmem(th, wp, cins, coutp, ktot, out_itemsize, T)
    vmem_limit = int(min(limit_cap, max(int(1.4 * need), 32 << 20)))

    # ---- host-side operand prep (bf16 MXU operands, row-padded flat layout) --
    x_flat, main_specs, halo_specs = [], [], []
    for x, w, cin in zip(xs, ws, cins):
        Ni, Ti = x.shape[0], x.shape[1]
        assert x.shape[2:] == (cin, H, W)
        assert w.shape == (Cout, cin, 3, 3)
        assert Ni in (1, N) and Ti in (1, T)
        xp = jnp.pad(x.astype(jnp.bfloat16),
                     ((0, 0), (0, 0), (0, 0),
                      (1, h_in_pad - H - 1), (1, wp - W - 1)))
        x_flat.append(xp.reshape(Ni, Ti, cin, flat_in))

        def main_map(n, r, t, _nb=(Ni == 1), _tb=(Ti == 1)):
            return (0 if _nb else n, 0 if _tb else t, 0, r)

        def halo_map(n, r, t, _nb=(Ni == 1), _tb=(Ti == 1), _s=th // 4):
            return (0 if _nb else n, 0 if _tb else t, 0, (r + 1) * _s)

        main_specs.append(pl.BlockSpec((1, 1, cin, lout), main_map))
        # 2-row conv halo fetched via a second lane-aligned view of the SAME
        # array (4 rows for 128-alignment headroom) -- no host-side duplication
        # and no manual DMA needed; only ~2 extra rows of HBM traffic per chunk.
        halo_specs.append(pl.BlockSpec((1, 1, cin, 4 * wp), halo_map))

    # prepacked stacked-K weights: (Cout, Cin, 3, 3) -> (Coutp, 9*sum(Cin)),
    # column order (input, dy, dx, cin) matching the in-kernel RHS stacking.
    w_parts = [jnp.transpose(w, (0, 2, 3, 1)).reshape(Cout, 9 * c)
               for w, c in zip(ws, cins)]
    w_stk = jnp.concatenate(w_parts, axis=1)
    w_stk = jnp.pad(w_stk, ((0, coutp - Cout), (0, 0))).astype(jnp.bfloat16)
    b_col = jnp.pad(bias, (0, coutp - Cout)).reshape(coutp, 1).astype(jnp.float32)

    in_specs = main_specs + halo_specs + [
        pl.BlockSpec((coutp, ktot), lambda n, r, t: (0, 0)),   # resident weights
        pl.BlockSpec((coutp, 1), lambda n, r, t: (0, 0)),      # resident bias
    ]
    scratch = (pltpu.VMEM((coutp, lout), jnp.float32),) if T > 1 else ()

    out = pl.pallas_call(
        _make_conv_kernel(n_in, wp, th, T),
        out_shape=jax.ShapeDtypeStruct((N, coutp, h_out_pad * wp), out_dtype),
        grid_spec=pltpu.PrefetchScalarGridSpec(
            num_scalar_prefetch=0,
            grid=(N, n_chunks, T),
            in_specs=in_specs,
            out_specs=pl.BlockSpec((1, coutp, lout), lambda n, r, t: (n, 0, r)),
            scratch_shapes=scratch),
        compiler_params=pltpu.CompilerParams(
            dimension_semantics=("parallel", "parallel", "arbitrary"),
            vmem_limit_bytes=vmem_limit),
    )(*x_flat, *x_flat, w_stk, b_col)

    # single host-side crop: drop channel pad, junk rows and junk columns.
    out = out.reshape(N, coutp, h_out_pad, wp)
    c0, c1 = (0, W) if w_crop is None else w_crop
    return out[:, :Cout, :H, c0:c1]


# ----------------------------------------------------------------------------
# Model (simplified Encoder / Input / Decoder, exact top-level glue)
# ----------------------------------------------------------------------------
def init_params(key, in_chan, h_state_dims, generate_channels, x_dims):
    k1, k2, k3, k4, k5, k6 = jax.random.split(key, 6)
    scale = 0.1
    return {
        "enc_w": scale * jax.random.normal(k1, (h_state_dims, in_chan, 3, 3), jnp.float32),
        "enc_b": scale * jax.random.normal(k2, (h_state_dims,), jnp.float32),
        "gen_w": scale * jax.random.normal(k3, (generate_channels, in_chan, 3, 3), jnp.float32),
        "gen_b": scale * jax.random.normal(k4, (generate_channels,), jnp.float32),
        "dec_w": scale * jax.random.normal(
            k5, (x_dims, generate_channels + h_state_dims, 3, 3), jnp.float32),
        "dec_b": scale * jax.random.normal(k6, (x_dims,), jnp.float32),
    }


def model_forward(x, params):
    # x: (b, t, c, h, w) float32
    b, t, c, h, w = x.shape

    # exact glue: zero-pad width by 8 on each side
    padding = jnp.zeros((b, t, c, h, 8), x.dtype)
    x = jnp.concatenate([padding, x, padding], axis=4)          # (b, t, c, h, w+16)

    # --- Encoder (simplified): per-frame conv3x3+bias+ReLU fused with the
    # time-mean inside one pallas_call (resident fp32 accumulator over t), so
    # the (b*t, hd, h, wp) encoder activation never round-trips through HBM.
    hidden = conv3x3_relu_fused([x], [params["enc_w"]], params["enc_b"],
                                out_dtype=jnp.bfloat16)         # (b, hd, h, w+16)
    hidden_states = [hidden]

    # --- Input generation (simplified): batch/time-averaged conv3x3+ReLU -----
    # TODO(synk): fold this (b,t)-mean of x into the encoder kernel as a second
    # resident output to save one extra HBM read of the padded input.
    gen_in = x.mean(axis=(0, 1))[None, None]                    # (1, 1, c, h, w+16)
    gen_out = conv3x3_relu_fused([gen_in], [params["gen_w"]], params["gen_b"],
                                 out_dtype=jnp.bfloat16)        # (1, gc, h, w+16)

    # --- Decoder (simplified) -------------------------------------------------
    # The generated input is identical across the einops batch-repeat and both
    # operands are identical across the 20 decoding steps, so the decoder conv
    # runs once per batch element; the batch broadcast happens via the Pallas
    # index_map and the 20-step repeat is a broadcast of the small output
    # (bit-identical to materializing the 20x-tiled decoder input).
    rep = hidden_states[0].shape[0]                             # einops repeat == b
    gc = gen_out.shape[1]
    dec_w_gen = params["dec_w"][:, :gc]                         # (x_dims, gc, 3, 3)
    dec_w_hid = params["dec_w"][:, gc:]                         # (x_dims, hd, 3, 3)
    dec_out = conv3x3_relu_fused(
        [gen_out[:, None], hidden_states[0][:, None]],
        [dec_w_gen, dec_w_hid], params["dec_b"],
        out_dtype=jnp.float32,
        w_crop=(8, 8 + w))                                      # (b, x_dims, h, w)

    outputs = jnp.broadcast_to(dec_out[:, None],
                               (rep, 20, dec_out.shape[1], h, w))
    return outputs


# ----------------------------------------------------------------------------
if __name__ == "__main__":
    # small, module-consistent shapes
    b, t, c, h, w = 2, 3, 4, 8, 16
    h_state_dims = 8
    generate_channels = 6
    x_dims = 5

    key = jax.random.PRNGKey(0)
    kx, kp = jax.random.split(key)
    x = jax.random.normal(kx, (b, t, c, h, w), jnp.float32)
    params = init_params(kp, c, h_state_dims, generate_channels, x_dims)

    out = jax.jit(functools.partial(model_forward, params=params))(x)
    out = jax.block_until_ready(out)
    assert out.shape == (b, 20, x_dims, h, w), out.shape
    assert bool(jnp.isfinite(out).all())
    print("KERNEL_OK")
</pallas_src>

<mosaic_0001>
module attributes {stable_mosaic.version = 11 : i64} {
  func.func @kernel(%arg0: i32, %arg1: i32, %arg2: i32, %arg3: memref<1x1x4x1024xbf16, #tpu.memory_space<vmem>>, %arg4: memref<1x1x4x512xbf16, #tpu.memory_space<vmem>>, %arg5: memref<16x36xbf16, #tpu.memory_space<vmem>>, %arg6: memref<16x1xf32, #tpu.memory_space<vmem>>, %arg7: memref<1x16x1024xbf16, #tpu.memory_space<vmem>>) attributes {dimension_semantics = [#tpu.dimension_semantics<parallel>, #tpu.dimension_semantics<parallel>, #tpu.dimension_semantics<arbitrary>], iteration_bounds = array<i64: 1, 1, 1>, scalar_prefetch = 0 : i64, scratch_operands = 0 : i64, tpu.core_type = #tpu.core_type<tc>, window_params = [{transform_indices = @transform_0, window_bounds = array<i64: 1, 1, 4, 1024>}, {transform_indices = @transform_1, window_bounds = array<i64: 1, 1, 4, 512>}, {pipeline_mode = #tpu.pipeline_mode<synchronous>, transform_indices = @transform_2, window_bounds = array<i64: 16, 36>}, {pipeline_mode = #tpu.pipeline_mode<synchronous>, transform_indices = @transform_3, window_bounds = array<i64: 16, 1>}, {transform_indices = @transform_4, window_bounds = array<i64: 1, 16, 1024>}]} {
    %c0 = arith.constant 0 : index
    %c0_0 = arith.constant 0 : index
    %c0_1 = arith.constant 0 : index
    %c0_2 = arith.constant 0 : index
    %0 = vector.load %arg3[%c0, %c0_0, %c0_1, %c0_2] : memref<1x1x4x1024xbf16, #tpu.memory_space<vmem>>, vector<1x1x4x1024xbf16>
    %1 = vector.shape_cast %0 : vector<1x1x4x1024xbf16> to vector<4x1024xbf16>
    %c0_3 = arith.constant 0 : index
    %c0_4 = arith.constant 0 : index
    %c0_5 = arith.constant 0 : index
    %c0_6 = arith.constant 0 : index
    %2 = vector.load %arg4[%c0_3, %c0_4, %c0_5, %c0_6] : memref<1x1x4x512xbf16, #tpu.memory_space<vmem>>, vector<1x1x4x512xbf16>
    %3 = vector.shape_cast %2 : vector<1x1x4x512xbf16> to vector<4x512xbf16>
    %4 = tpu.concatenate %1, %3 in 1 : vector<4x1024xbf16>, vector<4x512xbf16> -> vector<4x1536xbf16>
    %5 = vector.extract_strided_slice %4 {offsets = [0, 0], sizes = [4, 1280], strides = [1, 1]} : vector<4x1536xbf16> to vector<4x1280xbf16>
    %6 = vector.extract_strided_slice %4 {offsets = [0, 1], sizes = [4, 1280], strides = [1, 1]} : vector<4x1536xbf16> to vector<4x1280xbf16>
    %7 = vector.extract_strided_slice %4 {offsets = [0, 2], sizes = [4, 1280], strides = [1, 1]} : vector<4x1536xbf16> to vector<4x1280xbf16>
    %8 = vector.extract_strided_slice %5 {offsets = [0, 0], sizes = [4, 1024], strides = [1, 1]} : vector<4x1280xbf16> to vector<4x1024xbf16>
    %9 = vector.extract_strided_slice %6 {offsets = [0, 0], sizes = [4, 1024], strides = [1, 1]} : vector<4x1280xbf16> to vector<4x1024xbf16>
    %10 = vector.extract_strided_slice %7 {offsets = [0, 0], sizes = [4, 1024], strides = [1, 1]} : vector<4x1280xbf16> to vector<4x1024xbf16>
    %11 = vector.extract_strided_slice %5 {offsets = [0, 128], sizes = [4, 1024], strides = [1, 1]} : vector<4x1280xbf16> to vector<4x1024xbf16>
    %12 = vector.extract_strided_slice %6 {offsets = [0, 128], sizes = [4, 1024], strides = [1, 1]} : vector<4x1280xbf16> to vector<4x1024xbf16>
    %13 = vector.extract_strided_slice %7 {offsets = [0, 128], sizes = [4, 1024], strides = [1, 1]} : vector<4x1280xbf16> to vector<4x1024xbf16>
    %14 = vector.extract_strided_slice %5 {offsets = [0, 256], sizes = [4, 1024], strides = [1, 1]} : vector<4x1280xbf16> to vector<4x1024xbf16>
    %15 = vector.extract_strided_slice %6 {offsets = [0, 256], sizes = [4, 1024], strides = [1, 1]} : vector<4x1280xbf16> to vector<4x1024xbf16>
    %16 = vector.extract_strided_slice %7 {offsets = [0, 256], sizes = [4, 1024], strides = [1, 1]} : vector<4x1280xbf16> to vector<4x1024xbf16>
    %17 = tpu.concatenate %8, %9, %10, %11, %12, %13, %14, %15, %16 in 0 : vector<4x1024xbf16>, vector<4x1024xbf16>, vector<4x1024xbf16>, vector<4x1024xbf16>, vector<4x1024xbf16>, vector<4x1024xbf16>, vector<4x1024xbf16>, vector<4x1024xbf16>, vector<4x1024xbf16> -> vector<36x1024xbf16>
    %c0_7 = arith.constant 0 : index
    %c0_8 = arith.constant 0 : index
    %18 = vector.load %arg5[%c0_7, %c0_8] : memref<16x36xbf16, #tpu.memory_space<vmem>>, vector<16x36xbf16>
    %cst = arith.constant dense<0.000000e+00> : vector<16x1024xf32>
    %19 = tpu.matmul %18, %17, %cst {dimension_numbers = #tpu.dot_dimension_numbers<[1], [0], [0], [1], [0, 0, 1, 1], [], []>} : vector<16x36xbf16>, vector<36x1024xbf16>, vector<16x1024xf32> -> vector<16x1024xf32>
    %c0_9 = arith.constant 0 : index
    %c0_10 = arith.constant 0 : index
    %20 = vector.load %arg6[%c0_9, %c0_10] : memref<16x1xf32, #tpu.memory_space<vmem>>, vector<16x1xf32>
    %21 = vector.broadcast %20 : vector<16x1xf32> to vector<16x1024xf32>
    %22 = arith.addf %19, %21 : vector<16x1024xf32>
    %cst_11 = arith.constant 0.000000e+00 : f32
    %23 = vector.broadcast %cst_11 : f32 to vector<16x1024xf32>
    %24 = arith.maximumf %22, %23 : vector<16x1024xf32>
    %25 = arith.truncf %24 : vector<16x1024xf32> to vector<16x1024xbf16>
    %c0_12 = arith.constant 0 : index
    %c0_13 = arith.constant 0 : index
    %c0_14 = arith.constant 0 : index
    %26 = vector.load %arg7[%c0_12, %c0_13, %c0_14] : memref<1x16x1024xbf16, #tpu.memory_space<vmem>>, vector<1x16x1024xbf16>
    %27 = vector.shape_cast %26 : vector<1x16x1024xbf16> to vector<16x1024xbf16>
    %28 = vector.shape_cast %25 : vector<16x1024xbf16> to vector<1x16x1024xbf16>
    tpu.vector_store %arg7[%c0_12, %c0_13, %c0_14], %28 {strides = array<i32>} : memref<1x16x1024xbf16, #tpu.memory_space<vmem>>, vector<1x16x1024xbf16>,
    return
  }
  func.func @transform_0(%arg0: i32, %arg1: i32, %arg2: i32) -> (i32, i32, i32, i32) {
    %c0_i32 = arith.constant 0 : i32
    %c0_i32_0 = arith.constant 0 : i32
    %c0_i32_1 = arith.constant 0 : i32
    %c0_i32_2 = arith.constant 0 : i32
    return %c0_i32, %c0_i32_0, %c0_i32_1, %arg1 : i32, i32, i32, i32
  }
  func.func @transform_1(%arg0: i32, %arg1: i32, %arg2: i32) -> (i32, i32, i32, i32) {
    %c1_i32 = arith.constant 1 : i32
    %0 = arith.addi %arg1, %c1_i32 : i32
    %c2_i32 = arith.constant 2 : i32
    %1 = arith.muli %0, %c2_i32 : i32
    %c0_i32 = arith.constant 0 : i32
    %c0_i32_0 = arith.constant 0 : i32
    %c0_i32_1 = arith.constant 0 : i32
    %c0_i32_2 = arith.constant 0 : i32
    return %c0_i32, %c0_i32_0, %c0_i32_1, %1 : i32, i32, i32, i32
  }
  func.func @transform_2(%arg0: i32, %arg1: i32, %arg2: i32) -> (i32, i32) {
    %c0_i32 = arith.constant 0 : i32
    %c0_i32_0 = arith.constant 0 : i32
    %c0_i32_1 = arith.constant 0 : i32
    return %c0_i32, %c0_i32_0 : i32, i32
  }
  func.func @transform_3(%arg0: i32, %arg1: i32, %arg2: i32) -> (i32, i32) {
    %c0_i32 = arith.constant 0 : i32
    %c0_i32_0 = arith.constant 0 : i32
    %c0_i32_1 = arith.constant 0 : i32
    return %c0_i32, %c0_i32_0 : i32, i32
  }
  func.func @transform_4(%arg0: i32, %arg1: i32, %arg2: i32) -> (i32, i32, i32) {
    %c0_i32 = arith.constant 0 : i32
    %c0_i32_0 = arith.constant 0 : i32
    return %arg0, %c0_i32, %arg1 : i32, i32, i32
  }
}

module attributes {stable_mosaic.version = 11 : i64} {
  func.func @kernel(%arg0: i32, %arg1: i32, %arg2: i32, %arg3: memref<1x1x4x1024xbf16, #tpu.memory_space<vmem>>, %arg4: memref<1x1x4x512xbf16, #tpu.memory_space<vmem>>, %arg5: memref<16x36xbf16, #tpu.memory_space<vmem>>, %arg6: memref<16x1xf32, #tpu.memory_space<vmem>>, %arg7: memref<1x16x1024xbf16, #tpu.memory_space<vmem>>, %arg8: memref<16x1024xf32, #tpu.memory_space<vmem>>) attributes {dimension_semantics = [#tpu.dimension_semantics<parallel>, #tpu.dimension_semantics<parallel>, #tpu.dimension_semantics<arbitrary>], iteration_bounds = array<i64: 2, 1, 3>, scalar_prefetch = 0 : i64, scratch_operands = 1 : i64, tpu.core_type = #tpu.core_type<tc>, window_params = [{transform_indices = @transform_0, window_bounds = array<i64: 1, 1, 4, 1024>}, {transform_indices = @transform_1, window_bounds = array<i64: 1, 1, 4, 512>}, {pipeline_mode = #tpu.pipeline_mode<synchronous>, transform_indices = @transform_2, window_bounds = array<i64: 16, 36>}, {pipeline_mode = #tpu.pipeline_mode<synchronous>, transform_indices = @transform_3, window_bounds = array<i64: 16, 1>}, {transform_indices = @transform_4, window_bounds = array<i64: 1, 16, 1024>}]} {
    %c0 = arith.constant 0 : index
    %c0_0 = arith.constant 0 : index
    %c0_1 = arith.constant 0 : index
    %c0_2 = arith.constant 0 : index
    %0 = vector.load %arg3[%c0, %c0_0, %c0_1, %c0_2] : memref<1x1x4x1024xbf16, #tpu.memory_space<vmem>>, vector<1x1x4x1024xbf16>
    %1 = vector.shape_cast %0 : vector<1x1x4x1024xbf16> to vector<4x1024xbf16>
    %c0_3 = arith.constant 0 : index
    %c0_4 = arith.constant 0 : index
    %c0_5 = arith.constant 0 : index
    %c0_6 = arith.constant 0 : index
    %2 = vector.load %arg4[%c0_3, %c0_4, %c0_5, %c0_6] : memref<1x1x4x512xbf16, #tpu.memory_space<vmem>>, vector<1x1x4x512xbf16>
    %3 = vector.shape_cast %2 : vector<1x1x4x512xbf16> to vector<4x512xbf16>
    %4 = tpu.concatenate %1, %3 in 1 : vector<4x1024xbf16>, vector<4x512xbf16> -> vector<4x1536xbf16>
    %5 = vector.extract_strided_slice %4 {offsets = [0, 0], sizes = [4, 1280], strides = [1, 1]} : vector<4x1536xbf16> to vector<4x1280xbf16>
    %6 = vector.extract_strided_slice %4 {offsets = [0, 1], sizes = [4, 1280], strides = [1, 1]} : vector<4x1536xbf16> to vector<4x1280xbf16>
    %7 = vector.extract_strided_slice %4 {offsets = [0, 2], sizes = [4, 1280], strides = [1, 1]} : vector<4x1536xbf16> to vector<4x1280xbf16>
    %8 = vector.extract_strided_slice %5 {offsets = [0, 0], sizes = [4, 1024], strides = [1, 1]} : vector<4x1280xbf16> to vector<4x1024xbf16>
    %9 = vector.extract_strided_slice %6 {offsets = [0, 0], sizes = [4, 1024], strides = [1, 1]} : vector<4x1280xbf16> to vector<4x1024xbf16>
    %10 = vector.extract_strided_slice %7 {offsets = [0, 0], sizes = [4, 1024], strides = [1, 1]} : vector<4x1280xbf16> to vector<4x1024xbf16>
    %11 = vector.extract_strided_slice %5 {offsets = [0, 128], sizes = [4, 1024], strides = [1, 1]} : vector<4x1280xbf16> to vector<4x1024xbf16>
    %12 = vector.extract_strided_slice %6 {offsets = [0, 128], sizes = [4, 1024], strides = [1, 1]} : vector<4x1280xbf16> to vector<4x1024xbf16>
    %13 = vector.extract_strided_slice %7 {offsets = [0, 128], sizes = [4, 1024], strides = [1, 1]} : vector<4x1280xbf16> to vector<4x1024xbf16>
    %14 = vector.extract_strided_slice %5 {offsets = [0, 256], sizes = [4, 1024], strides = [1, 1]} : vector<4x1280xbf16> to vector<4x1024xbf16>
    %15 = vector.extract_strided_slice %6 {offsets = [0, 256], sizes = [4, 1024], strides = [1, 1]} : vector<4x1280xbf16> to vector<4x1024xbf16>
    %16 = vector.extract_strided_slice %7 {offsets = [0, 256], sizes = [4, 1024], strides = [1, 1]} : vector<4x1280xbf16> to vector<4x1024xbf16>
    %17 = tpu.concatenate %8, %9, %10, %11, %12, %13, %14, %15, %16 in 0 : vector<4x1024xbf16>, vector<4x1024xbf16>, vector<4x1024xbf16>, vector<4x1024xbf16>, vector<4x1024xbf16>, vector<4x1024xbf16>, vector<4x1024xbf16>, vector<4x1024xbf16>, vector<4x1024xbf16> -> vector<36x1024xbf16>
    %c0_7 = arith.constant 0 : index
    %c0_8 = arith.constant 0 : index
    %18 = vector.load %arg5[%c0_7, %c0_8] : memref<16x36xbf16, #tpu.memory_space<vmem>>, vector<16x36xbf16>
    %cst = arith.constant dense<0.000000e+00> : vector<16x1024xf32>
    %19 = tpu.matmul %18, %17, %cst {dimension_numbers = #tpu.dot_dimension_numbers<[1], [0], [0], [1], [0, 0, 1, 1], [], []>} : vector<16x36xbf16>, vector<36x1024xbf16>, vector<16x1024xf32> -> vector<16x1024xf32>
    %c0_9 = arith.constant 0 : index
    %c0_10 = arith.constant 0 : index
    %20 = vector.load %arg6[%c0_9, %c0_10] : memref<16x1xf32, #tpu.memory_space<vmem>>, vector<16x1xf32>
    %21 = vector.broadcast %20 : vector<16x1xf32> to vector<16x1024xf32>
    %22 = arith.addf %19, %21 : vector<16x1024xf32>
    %cst_11 = arith.constant 0.000000e+00 : f32
    %23 = vector.broadcast %cst_11 : f32 to vector<16x1024xf32>
    %24 = arith.maximumf %22, %23 : vector<16x1024xf32>
    %c0_i32 = arith.constant 0 : i32
    %25 = arith.cmpi eq, %arg2, %c0_i32 : i32
    %26 = arith.extui %25 : i1 to i32
    %c0_i32_12 = arith.constant 0 : i32
    %27 = arith.cmpi ne, %26, %c0_i32_12 : i32
    scf.if %27 {
      %cst_18 = arith.constant 0.000000e+00 : f32
      %34 = vector.broadcast %cst_18 : f32 to vector<16x1024xf32>
      %c0_19 = arith.constant 0 : index
      %c0_20 = arith.constant 0 : index
      %35 = vector.load %arg8[%c0_19, %c0_20] : memref<16x1024xf32, #tpu.memory_space<vmem>>, vector<16x1024xf32>
      tpu.vector_store %arg8[%c0_19, %c0_20], %34 {strides = array<i32>} : memref<16x1024xf32, #tpu.memory_space<vmem>>, vector<16x1024xf32>,
    } else {
    }
    %c0_13 = arith.constant 0 : index
    %c0_14 = arith.constant 0 : index
    %28 = vector.load %arg8[%c0_13, %c0_14] : memref<16x1024xf32, #tpu.memory_space<vmem>>, vector<16x1024xf32>
    %29 = arith.addf %28, %24 : vector<16x1024xf32>
    %c0_15 = arith.constant 0 : index
    %c0_16 = arith.constant 0 : index
    %30 = vector.load %arg8[%c0_15, %c0_16] : memref<16x1024xf32, #tpu.memory_space<vmem>>, vector<16x1024xf32>
    tpu.vector_store %arg8[%c0_15, %c0_16], %29 {strides = array<i32>} : memref<16x1024xf32, #tpu.memory_space<vmem>>, vector<16x1024xf32>,
    %c2_i32 = arith.constant 2 : i32
    %31 = arith.cmpi eq, %arg2, %c2_i32 : i32
    %32 = arith.extui %31 : i1 to i32
    %c0_i32_17 = arith.constant 0 : i32
    %33 = arith.cmpi ne, %32, %c0_i32_17 : i32
    scf.if %33 {
      %c0_18 = arith.constant 0 : index
      %c0_19 = arith.constant 0 : index
      %34 = vector.load %arg8[%c0_18, %c0_19] : memref<16x1024xf32, #tpu.memory_space<vmem>>, vector<16x1024xf32>
      %cst_20 = arith.constant 0.333333343 : f32
      %35 = vector.broadcast %cst_20 : f32 to vector<16x1024xf32>
      %36 = arith.mulf %34, %35 : vector<16x1024xf32>
      %37 = arith.truncf %36 : vector<16x1024xf32> to vector<16x1024xbf16>
      %c0_21 = arith.constant 0 : index
      %c0_22 = arith.constant 0 : index
      %c0_23 = arith.constant 0 : index
      %38 = vector.load %arg7[%c0_21, %c0_22, %c0_23] : memref<1x16x1024xbf16, #tpu.memory_space<vmem>>, vector<1x16x1024xbf16>
      %39 = vector.shape_cast %38 : vector<1x16x1024xbf16> to vector<16x1024xbf16>
      %40 = vector.shape_cast %37 : vector<16x1024xbf16> to vector<1x16x1024xbf16>
      tpu.vector_store %arg7[%c0_21, %c0_22, %c0_23], %40 {strides = array<i32>} : memref<1x16x1024xbf16, #tpu.memory_space<vmem>>, vector<1x16x1024xbf16>,
    } else {
    }
    return
  }
  func.func @transform_0(%arg0: i32, %arg1: i32, %arg2: i32) -> (i32, i32, i32, i32) {
    %c0_i32 = arith.constant 0 : i32
    %c0_i32_0 = arith.constant 0 : i32
    return %arg0, %arg2, %c0_i32, %arg1 : i32, i32, i32, i32
  }
  func.func @transform_1(%arg0: i32, %arg1: i32, %arg2: i32) -> (i32, i32, i32, i32) {
    %c1_i32 = arith.constant 1 : i32
    %0 = arith.addi %arg1, %c1_i32 : i32
    %c2_i32 = arith.constant 2 : i32
    %1 = arith.muli %0, %c2_i32 : i32
    %c0_i32 = arith.constant 0 : i32
    %c0_i32_0 = arith.constant 0 : i32
    return %arg0, %arg2, %c0_i32, %1 : i32, i32, i32, i32
  }
  func.func @transform_2(%arg0: i32, %arg1: i32, %arg2: i32) -> (i32, i32) {
    %c0_i32 = arith.constant 0 : i32
    %c0_i32_0 = arith.constant 0 : i32
    %c0_i32_1 = arith.constant 0 : i32
    return %c0_i32, %c0_i32_0 : i32, i32
  }
  func.func @transform_3(%arg0: i32, %arg1: i32, %arg2: i32) -> (i32, i32) {
    %c0_i32 = arith.constant 0 : i32
    %c0_i32_0 = arith.constant 0 : i32
    %c0_i32_1 = arith.constant 0 : i32
    return %c0_i32, %c0_i32_0 : i32, i32
  }
  func.func @transform_4(%arg0: i32, %arg1: i32, %arg2: i32) -> (i32, i32, i32) {
    %c0_i32 = arith.constant 0 : i32
    %c0_i32_0 = arith.constant 0 : i32
    return %arg0, %c0_i32, %arg1 : i32, i32, i32
  }
}

module attributes {stable_mosaic.version = 11 : i64} {
  func.func @kernel(%arg0: i32, %arg1: i32, %arg2: i32, %arg3: memref<1x1x6x1024xbf16, #tpu.memory_space<vmem>>, %arg4: memref<1x1x8x1024xbf16, #tpu.memory_space<vmem>>, %arg5: memref<1x1x6x512xbf16, #tpu.memory_space<vmem>>, %arg6: memref<1x1x8x512xbf16, #tpu.memory_space<vmem>>, %arg7: memref<8x126xbf16, #tpu.memory_space<vmem>>, %arg8: memref<8x1xf32, #tpu.memory_space<vmem>>, %arg9: memref<1x8x1024xf32, #tpu.memory_space<vmem>>) attributes {dimension_semantics = [#tpu.dimension_semantics<parallel>, #tpu.dimension_semantics<parallel>, #tpu.dimension_semantics<arbitrary>], iteration_bounds = array<i64: 2, 1, 1>, scalar_prefetch = 0 : i64, scratch_operands = 0 : i64, tpu.core_type = #tpu.core_type<tc>, window_params = [{transform_indices = @transform_0, window_bounds = array<i64: 1, 1, 6, 1024>}, {transform_indices = @transform_1, window_bounds = array<i64: 1, 1, 8, 1024>}, {transform_indices = @transform_2, window_bounds = array<i64: 1, 1, 6, 512>}, {transform_indices = @transform_3, window_bounds = array<i64: 1, 1, 8, 512>}, {pipeline_mode = #tpu.pipeline_mode<synchronous>, transform_indices = @transform_4, window_bounds = array<i64: 8, 126>}, {pipeline_mode = #tpu.pipeline_mode<synchronous>, transform_indices = @transform_5, window_bounds = array<i64: 8, 1>}, {transform_indices = @transform_6, window_bounds = array<i64: 1, 8, 1024>}]} {
    %c0 = arith.constant 0 : index
    %c0_0 = arith.constant 0 : index
    %c0_1 = arith.constant 0 : index
    %c0_2 = arith.constant 0 : index
    %0 = vector.load %arg3[%c0, %c0_0, %c0_1, %c0_2] : memref<1x1x6x1024xbf16, #tpu.memory_space<vmem>>, vector<1x1x6x1024xbf16>
    %1 = vector.shape_cast %0 : vector<1x1x6x1024xbf16> to vector<6x1024xbf16>
    %c0_3 = arith.constant 0 : index
    %c0_4 = arith.constant 0 : index
    %c0_5 = arith.constant 0 : index
    %c0_6 = arith.constant 0 : index
    %2 = vector.load %arg5[%c0_3, %c0_4, %c0_5, %c0_6] : memref<1x1x6x512xbf16, #tpu.memory_space<vmem>>, vector<1x1x6x512xbf16>
    %3 = vector.shape_cast %2 : vector<1x1x6x512xbf16> to vector<6x512xbf16>
    %4 = tpu.concatenate %1, %3 in 1 : vector<6x1024xbf16>, vector<6x512xbf16> -> vector<6x1536xbf16>
    %5 = vector.extract_strided_slice %4 {offsets = [0, 0], sizes = [6, 1280], strides = [1, 1]} : vector<6x1536xbf16> to vector<6x1280xbf16>
    %6 = vector.extract_strided_slice %4 {offsets = [0, 1], sizes = [6, 1280], strides = [1, 1]} : vector<6x1536xbf16> to vector<6x1280xbf16>
    %7 = vector.extract_strided_slice %4 {offsets = [0, 2], sizes = [6, 1280], strides = [1, 1]} : vector<6x1536xbf16> to vector<6x1280xbf16>
    %8 = vector.extract_strided_slice %5 {offsets = [0, 0], sizes = [6, 1024], strides = [1, 1]} : vector<6x1280xbf16> to vector<6x1024xbf16>
    %9 = vector.extract_strided_slice %6 {offsets = [0, 0], sizes = [6, 1024], strides = [1, 1]} : vector<6x1280xbf16> to vector<6x1024xbf16>
    %10 = vector.extract_strided_slice %7 {offsets = [0, 0], sizes = [6, 1024], strides = [1, 1]} : vector<6x1280xbf16> to vector<6x1024xbf16>
    %11 = vector.extract_strided_slice %5 {offsets = [0, 128], sizes = [6, 1024], strides = [1, 1]} : vector<6x1280xbf16> to vector<6x1024xbf16>
    %12 = vector.extract_strided_slice %6 {offsets = [0, 128], sizes = [6, 1024], strides = [1, 1]} : vector<6x1280xbf16> to vector<6x1024xbf16>
    %13 = vector.extract_strided_slice %7 {offsets = [0, 128], sizes = [6, 1024], strides = [1, 1]} : vector<6x1280xbf16> to vector<6x1024xbf16>
    %14 = vector.extract_strided_slice %5 {offsets = [0, 256], sizes = [6, 1024], strides = [1, 1]} : vector<6x1280xbf16> to vector<6x1024xbf16>
    %15 = vector.extract_strided_slice %6 {offsets = [0, 256], sizes = [6, 1024], strides = [1, 1]} : vector<6x1280xbf16> to vector<6x1024xbf16>
    %16 = vector.extract_strided_slice %7 {offsets = [0, 256], sizes = [6, 1024], strides = [1, 1]} : vector<6x1280xbf16> to vector<6x1024xbf16>
    %c0_7 = arith.constant 0 : index
    %c0_8 = arith.constant 0 : index
    %c0_9 = arith.constant 0 : index
    %c0_10 = arith.constant 0 : index
    %17 = vector.load %arg4[%c0_7, %c0_8, %c0_9, %c0_10] : memref<1x1x8x1024xbf16, #tpu.memory_space<vmem>>, vector<1x1x8x1024xbf16>
    %18 = vector.shape_cast %17 : vector<1x1x8x1024xbf16> to vector<8x1024xbf16>
    %c0_11 = arith.constant 0 : index
    %c0_12 = arith.constant 0 : index
    %c0_13 = arith.constant 0 : index
    %c0_14 = arith.constant 0 : index
    %19 = vector.load %arg6[%c0_11, %c0_12, %c0_13, %c0_14] : memref<1x1x8x512xbf16, #tpu.memory_space<vmem>>, vector<1x1x8x512xbf16>
    %20 = vector.shape_cast %19 : vector<1x1x8x512xbf16> to vector<8x512xbf16>
    %21 = tpu.concatenate %18, %20 in 1 : vector<8x1024xbf16>, vector<8x512xbf16> -> vector<8x1536xbf16>
    %22 = vector.extract_strided_slice %21 {offsets = [0, 0], sizes = [8, 1280], strides = [1, 1]} : vector<8x1536xbf16> to vector<8x1280xbf16>
    %23 = vector.extract_strided_slice %21 {offsets = [0, 1], sizes = [8, 1280], strides = [1, 1]} : vector<8x1536xbf16> to vector<8x1280xbf16>
    %24 = vector.extract_strided_slice %21 {offsets = [0, 2], sizes = [8, 1280], strides = [1, 1]} : vector<8x1536xbf16> to vector<8x1280xbf16>
    %25 = vector.extract_strided_slice %22 {offsets = [0, 0], sizes = [8, 1024], strides = [1, 1]} : vector<8x1280xbf16> to vector<8x1024xbf16>
    %26 = vector.extract_strided_slice %23 {offsets = [0, 0], sizes = [8, 1024], strides = [1, 1]} : vector<8x1280xbf16> to vector<8x1024xbf16>
    %27 = vector.extract_strided_slice %24 {offsets = [0, 0], sizes = [8, 1024], strides = [1, 1]} : vector<8x1280xbf16> to vector<8x1024xbf16>
    %28 = vector.extract_strided_slice %22 {offsets = [0, 128], sizes = [8, 1024], strides = [1, 1]} : vector<8x1280xbf16> to vector<8x1024xbf16>
    %29 = vector.extract_strided_slice %23 {offsets = [0, 128], sizes = [8, 1024], strides = [1, 1]} : vector<8x1280xbf16> to vector<8x1024xbf16>
    %30 = vector.extract_strided_slice %24 {offsets = [0, 128], sizes = [8, 1024], strides = [1, 1]} : vector<8x1280xbf16> to vector<8x1024xbf16>
    %31 = vector.extract_strided_slice %22 {offsets = [0, 256], sizes = [8, 1024], strides = [1, 1]} : vector<8x1280xbf16> to vector<8x1024xbf16>
    %32 = vector.extract_strided_slice %23 {offsets = [0, 256], sizes = [8, 1024], strides = [1, 1]} : vector<8x1280xbf16> to vector<8x1024xbf16>
    %33 = vector.extract_strided_slice %24 {offsets = [0, 256], sizes = [8, 1024], strides = [1, 1]} : vector<8x1280xbf16> to vector<8x1024xbf16>
    %34 = tpu.concatenate %8, %9, %10, %11, %12, %13, %14, %15, %16, %25, %26, %27, %28, %29, %30, %31 in 0 : vector<6x1024xbf16>, vector<6x1024xbf16>, vector<6x1024xbf16>, vector<6x1024xbf16>, vector<6x1024xbf16>, vector<6x1024xbf16>, vector<6x1024xbf16>, vector<6x1024xbf16>, vector<6x1024xbf16>, vector<8x1024xbf16>, vector<8x1024xbf16>, vector<8x1024xbf16>, vector<8x1024xbf16>, vector<8x1024xbf16>, vector<8x1024xbf16>, vector<8x1024xbf16> -> vector<110x1024xbf16>
    %35 = tpu.concatenate %32, %33 in 0 : vector<8x1024xbf16>, vector<8x1024xbf16> -> vector<16x1024xbf16>
    %36 = tpu.concatenate %34, %35 in 0 : vector<110x1024xbf16>, vector<16x1024xbf16> -> vector<126x1024xbf16>
    %c0_15 = arith.constant 0 : index
    %c0_16 = arith.constant 0 : index
    %37 = vector.load %arg7[%c0_15, %c0_16] : memref<8x126xbf16, #tpu.memory_space<vmem>>, vector<8x126xbf16>
    %cst = arith.constant dense<0.000000e+00> : vector<8x1024xf32>
    %38 = tpu.matmul %37, %36, %cst {dimension_numbers = #tpu.dot_dimension_numbers<[1], [0], [0], [1], [0, 0, 1, 1], [], []>} : vector<8x126xbf16>, vector<126x1024xbf16>, vector<8x1024xf32> -> vector<8x1024xf32>
    %c0_17 = arith.constant 0 : index
    %c0_18 = arith.constant 0 : index
    %39 = vector.load %arg8[%c0_17, %c0_18] : memref<8x1xf32, #tpu.memory_space<vmem>>, vector<8x1xf32>
    %40 = vector.broadcast %39 : vector<8x1xf32> to vector<8x1024xf32>
    %41 = arith.addf %38, %40 : vector<8x1024xf32>
    %cst_19 = arith.constant 0.000000e+00 : f32
    %42 = vector.broadcast %cst_19 : f32 to vector<8x1024xf32>
    %43 = arith.maximumf %41, %42 : vector<8x1024xf32>
    %c0_20 = arith.constant 0 : index
    %c0_21 = arith.constant 0 : index
    %c0_22 = arith.constant 0 : index
    %44 = vector.load %arg9[%c0_20, %c0_21, %c0_22] : memref<1x8x1024xf32, #tpu.memory_space<vmem>>, vector<1x8x1024xf32>
    %45 = vector.shape_cast %44 : vector<1x8x1024xf32> to vector<8x1024xf32>
    %46 = vector.shape_cast %43 : vector<8x1024xf32> to vector<1x8x1024xf32>
    tpu.vector_store %arg9[%c0_20, %c0_21, %c0_22], %46 {strides = array<i32>} : memref<1x8x1024xf32, #tpu.memory_space<vmem>>, vector<1x8x1024xf32>,
    return
  }
  func.func @transform_0(%arg0: i32, %arg1: i32, %arg2: i32) -> (i32, i32, i32, i32) {
    %c0_i32 = arith.constant 0 : i32
    %c0_i32_0 = arith.constant 0 : i32
    %c0_i32_1 = arith.constant 0 : i32
    %c0_i32_2 = arith.constant 0 : i32
    return %c0_i32, %c0_i32_0, %c0_i32_1, %arg1 : i32, i32, i32, i32
  }
  func.func @transform_1(%arg0: i32, %arg1: i32, %arg2: i32) -> (i32, i32, i32, i32) {
    %c0_i32 = arith.constant 0 : i32
    %c0_i32_0 = arith.constant 0 : i32
    %c0_i32_1 = arith.constant 0 : i32
    return %arg0, %c0_i32, %c0_i32_0, %arg1 : i32, i32, i32, i32
  }
  func.func @transform_2(%arg0: i32, %arg1: i32, %arg2: i32) -> (i32, i32, i32, i32) {
    %c1_i32 = arith.constant 1 : i32
    %0 = arith.addi %arg1, %c1_i32 : i32
    %c2_i32 = arith.constant 2 : i32
    %1 = arith.muli %0, %c2_i32 : i32
    %c0_i32 = arith.constant 0 : i32
    %c0_i32_0 = arith.constant 0 : i32
    %c0_i32_1 = arith.constant 0 : i32
    %c0_i32_2 = arith.constant 0 : i32
    return %c0_i32, %c0_i32_0, %c0_i32_1, %1 : i32, i32, i32, i32
  }
  func.func @transform_3(%arg0: i32, %arg1: i32, %arg2: i32) -> (i32, i32, i32, i32) {
    %c1_i32 = arith.constant 1 : i32
    %0 = arith.addi %arg1, %c1_i32 : i32
    %c2_i32 = arith.constant 2 : i32
    %1 = arith.muli %0, %c2_i32 : i32
    %c0_i32 = arith.constant 0 : i32
    %c0_i32_0 = arith.constant 0 : i32
    %c0_i32_1 = arith.constant 0 : i32
    return %arg0, %c0_i32, %c0_i32_0, %1 : i32, i32, i32, i32
  }
  func.func @transform_4(%arg0: i32, %arg1: i32, %arg2: i32) -> (i32, i32) {
    %c0_i32 = arith.constant 0 : i32
    %c0_i32_0 = arith.constant 0 : i32
    %c0_i32_1 = arith.constant 0 : i32
    return %c0_i32, %c0_i32_0 : i32, i32
  }
  func.func @transform_5(%arg0: i32, %arg1: i32, %arg2: i32) -> (i32, i32) {
    %c0_i32 = arith.constant 0 : i32
    %c0_i32_0 = arith.constant 0 : i32
    %c0_i32_1 = arith.constant 0 : i32
    return %c0_i32, %c0_i32_0 : i32, i32
  }
  func.func @transform_6(%arg0: i32, %arg1: i32, %arg2: i32) -> (i32, i32, i32) {
    %c0_i32 = arith.constant 0 : i32
    %c0_i32_0 = arith.constant 0 : i32
    return %arg0, %c0_i32, %arg1 : i32, i32, i32
  }
}

</mosaic_0001>

<bundles_post_ra>
// kernel: model_forward.4
= control target key start
LH: loop header
LB: loop body
LE: loop exit
PB: predicated region body
PF: predicated region fallthrough
CT: control target
= control target key end

     0   :  { %v54_v0 = vlaneseq  ;;  %v757_v1 = vmov 1983009808   ;;  %s758_s19 = smov 127   ;;  %v760_v35 = vmov 0   ;;  %vm128_vm0 = vcmask 1039360   ;;  %s1165_s0 = inlined_call_operand.vmem [shape: bf16[1,1,4,1536], index: 0, kind: input, shape index: {}, may-alias: {0,1}]   ;;  %s1166_s1 = inlined_call_operand.vmem [shape: bf16[1,1,4,1536], index: 1, kind: input, shape index: {}, may-alias: {0,1}]   ;;  %s1167_s2 = inlined_call_operand.vmem [shape: bf16[16,36], index: 2, kind: input, shape index: {}]   ;;  %s1168_s3 = inlined_call_operand.vmem [shape: f32[16,1], index: 3, kind: input, shape index: {}]   ;;  %s1169_s4 = inlined_call_operand.vmem [shape: bf16[1,16,1024], index: 4, kind: output, shape index: {}]  }
   0x1   :  { %v52_v2 = vunpack.c.l.s4 %v757_v1  ;;  %v45_v3 = vld [vmem:[%s1165_s0] sm:$0xff]  ;;  %v46_v7 = vld [vmem:[%s1165_s0 + $0x8] sm:$0xff]  ;;  %s759_s0 = smov 126   ;;  %v721_v31 = vld [vmem:[%s1166_s1 + $0x10] sm:$0xff]  ;;  %499 = vmatprep.mubr.bf16.mxu0 %v760_v35  ;;  %542 = vmatprep.mubr.bf16.mxu1 %v760_v35  ;;  %vm164_vm1 = vcmask 1031168   ;;  %vm289_vm2 = vcmask 1041408  }
   0x2   :  { %v55_v4 = vshrl.u32 %v54_v0, 7  ;;  %v50_v6 = vcombine.high %v45_v3, %v45_v3  ;;  %v67_v24 = vcombine.high %v46_v7, %v46_v7  ;;  %752 = vset.pattern.permute.xlu1 %v760_v35  ;;  %751 = vset.pattern.permute.xlu0 %v760_v35  ;;  %v85_v42 = vcombine.high %v721_v31, %v721_v31  ;;  %v422_v48 = vld [vmem:[%s1168_s3] sm:$0xff]  ;;  %v423_v49 = vld [vmem:[%s1168_s3 + $0x8] sm:$0xff] }
   0x3   :  { %v53_v5 = vunpack.c.0.s8 %v52_v2  ;;  %vm314_vm3 = vcmask 1043456   ;;  %vm331_vm4 = vcmask 1045504   ;;  %vm439_vm5 = vcmask 293888  }
   0x5   :  { %v792_v8 = vsub.s32 %v53_v5, %v55_v4 }
   0x7   :  { %v795_v9 = vrot.slane %v46_v7, %v792_v8  ;;  %v798_v10 = vrot.slane %v50_v6, %v792_v8  ;;  %v801_v11 = vrot.slane %v45_v3, %v792_v8  ;;  %v858_v27 = vrot.slane %v67_v24, %v792_v8 }
   0x8   :  { %v897_v34 = vrot.slane %v721_v31, %v792_v8  ;;  %v99_v45 = vrot.slane %v85_v42, %v792_v8 }
   0x9   :  { %v105_v12 = vrot.slane %v795_v9, 6  ;;  %v103_v13 = vrot.slane %v798_v10, 6  ;;  %v809_v14 = vcombine.high %v801_v11, %v801_v11  ;;  %v101_v15 = vrot.slane %v801_v11, 6 }
   0xa   :  { %v139_v16 = vrot.slane %v798_v10, 4  ;;  %v818_v17 = vcombine.high %v798_v10, %v798_v10  ;;  %v141_v20 = vrot.slane %v795_v9, 4  ;;  %v137_v21 = vrot.slane %v801_v11, 4 }
   0xb   :  { %118 = vrot.lane.b32.xlu1 %v105_v12, %s758_s19  ;;  %114 = vrot.lane.b32.xlu0 %v103_v13, %s758_s19  ;;  %v102_v18 = vrot.slane %v809_v14, 6  ;;  %v841_v22 = vcombine.high %v795_v9, %v795_v9  ;;  %v176_v26 = vrot.slane %v795_v9, 2  ;;  %v178_v29 = vrot.slane %v858_v27, 2 }
   0xc   :  { %v104_v19 = vrot.slane %v818_v17, 6  ;;  %v175_v25 = vrot.slane %v818_v17, 2  ;;  %v174_v30 = vrot.slane %v798_v10, 2  ;;  %v107_v32 = vrot.slane %v858_v27, 6 }
   0xd   :  { %v106_v23 = vrot.slane %v841_v22, 6  ;;  %v177_v28 = vrot.slane %v841_v22, 2  ;;  %v894_v33 = vcombine.high %v858_v27, %v858_v27  ;;  %v109_v37 = vrot.slane %v897_v34, 6 }
   0xe   :  { %v143_v38 = vrot.slane %v858_v27, 4  ;;  %v145_v39 = vrot.slane %v897_v34, 4  ;;  %v927_v40 = vcombine.high %v897_v34, %v897_v34  ;;  %v180_v44 = vrot.slane %v897_v34, 2 }
   0xf   :  { %148 = vrot.lane.b32.xlu1 %v809_v14, %s759_s0  ;;  %110 = vrot.lane.b32.xlu0 %v101_v15, %s758_s19  ;;  %v108_v36 = vrot.slane %v894_v33, 6  ;;  %v179_v43 = vrot.slane %v894_v33, 2  ;;  %v236_v47 = vrot.slane %v99_v45, 2  ;;  %v173_v2 = vrot.slane %v809_v14, 2 }
  0x10   :  { %v207_v41 = vrot.slane %v927_v40, 6  ;;  %v235_v46 = vrot.slane %v927_v40, 2 }
  0x13   :  { %150 = vrot.lane.b32.xlu0 %v139_v16, %s759_s0  ;;  %152 = vrot.lane.b32.xlu1 %v818_v17, %s759_s0 }
  0x17   :  { %112 = vrot.lane.b32.xlu0 %v102_v18, %s758_s19  ;;  %116 = vrot.lane.b32.xlu1 %v104_v19, %s758_s19 }
  0x1b   :  { %154 = vrot.lane.b32.xlu0 %v141_v20, %s759_s0  ;;  %146 = vrot.lane.b32.xlu1 %v137_v21, %s759_s0 }
  0x1f   :  { %183 = vrot.lane.b32.xlu0 %v798_v10, %s758_s19  ;;  %185 = vrot.lane.b32.xlu1 %v818_v17, %s758_s19 }
  0x23   :  { %187 = vrot.lane.b32.xlu0 %v795_v9, %s758_s19  ;;  %189 = vrot.lane.b32.xlu1 %v841_v22, %s758_s19 }
  0x27   :  { %210 = vrot.lane.b32.xlu0 %v103_v13, %s759_s0  ;;  %212 = vrot.lane.b32.xlu1 %v104_v19, %s759_s0 }
  0x2b   :  { %214 = vrot.lane.b32.xlu0 %v105_v12, %s759_s0  ;;  %216 = vrot.lane.b32.xlu1 %v106_v23, %s759_s0 }
  0x2f   :  { %181 = vrot.lane.b32.xlu0 %v809_v14, %s758_s19  ;;  %208 = vrot.lane.b32.xlu1 %v102_v18, %s759_s0 }
  0x33   :  { %239 = vrot.lane.b32.xlu0 %v175_v25, %s758_s19  ;;  %241 = vrot.lane.b32.xlu1 %v176_v26, %s758_s19 }
  0x37   :  { %243 = vrot.lane.b32.xlu0 %v177_v28, %s758_s19  ;;  %245 = vrot.lane.b32.xlu1 %v178_v29, %s758_s19 }
  0x3b   :  { %237 = vrot.lane.b32.xlu0 %v174_v30, %s758_s19  ;;  %263 = vrot.lane.b32.xlu1 %v798_v10, %s759_s0 }
  0x3f   :  { %265 = vrot.lane.b32.xlu0 %v818_v17, %s759_s0  ;;  %267 = vrot.lane.b32.xlu1 %v795_v9, %s759_s0 }
  0x43   :  { %269 = vrot.lane.b32.xlu0 %v841_v22, %s759_s0  ;;  %271 = vrot.lane.b32.xlu1 %v858_v27, %s759_s0 }
  0x47   :  { %120 = vrot.lane.b32.xlu0 %v106_v23, %s758_s19  ;;  %122 = vrot.lane.b32.xlu1 %v107_v32, %s758_s19 }
  0x4b   :  { %124 = vrot.lane.b32.xlu0 %v108_v36, %s758_s19  ;;  %126 = vrot.lane.b32.xlu1 %v109_v37, %s758_s19 }
  0x4f   :  { %156 = vrot.lane.b32.xlu0 %v841_v22, %s759_s0  ;;  %158 = vrot.lane.b32.xlu1 %v143_v38, %s759_s0 }
  0x53   :  { %160 = vrot.lane.b32.xlu0 %v894_v33, %s759_s0  ;;  %162 = vrot.lane.b32.xlu1 %v145_v39, %s759_s0 }
  0x57   :  { %191 = vrot.lane.b32.xlu0 %v858_v27, %s758_s19  ;;  %193 = vrot.lane.b32.xlu1 %v894_v33, %s758_s19 }
  0x5b   :  { %195 = vrot.lane.b32.xlu0 %v897_v34, %s758_s19  ;;  %197 = vrot.lane.b32.xlu1 %v927_v40, %s758_s19 }
  0x5f   :  { %218 = vrot.lane.b32.xlu0 %v107_v32, %s759_s0  ;;  %220 = vrot.lane.b32.xlu1 %v108_v36, %s759_s0 }
  0x63   :  { %222 = vrot.lane.b32.xlu0 %v109_v37, %s759_s0  ;;  %224 = vrot.lane.b32.xlu1 %v207_v41, %s759_s0 }
  0x67   :  { %247 = vrot.lane.b32.xlu0 %v179_v43, %s758_s19  ;;  %249 = vrot.lane.b32.xlu1 %v180_v44, %s758_s19 }
  0x6b   :  { %251 = vrot.lane.b32.xlu0 %v235_v46, %s758_s19  ;;  %253 = vrot.lane.b32.xlu1 %v236_v47, %s758_s19 }
  0x6f   :  { %273 = vrot.lane.b32.xlu0 %v894_v33, %s759_s0  ;;  %275 = vrot.lane.b32.xlu1 %v897_v34, %s759_s0 }
  0x73   :  { %277 = vrot.lane.b32.xlu0 %v927_v40, %s759_s0  ;;  %279 = vrot.lane.b32.xlu1 %v99_v45, %s759_s0 }
  0x77   :  { %426 = vperm.xlu0 %751, %v422_v48   ;;  %431 = vperm.xlu1 %752, %v423_v49  }
  0x7d   :  { %v963_v50 = vpop.permute.xlu1 %118  ;;  %v115_v51 = vpop.permute.xlu0 %114 }
  0x81   :  { %v149_v52 = vpop.permute.xlu1 %148  ;;  %v111_v53 = vpop.permute.xlu0 %110 }
  0x85   :  { %v151_v54 = vpop.permute.xlu0 %150  ;;  %v153_v55 = vpop.permute.xlu1 %152 }
  0x86   :  { %v166_v61 = vsel %vm164_vm1, %v149_v52, %v151_v54  ;;  %v167_v3 = vsel %vm164_vm1, %v151_v54, %v153_v55 }
  0x89   :  { %v113_v56 = vpop.permute.xlu0 %112  ;;  %v117_v57 = vpop.permute.xlu1 %116 }
  0x8a   :  { %v129_v58 = vsel %vm128_vm0, %v111_v53, %v113_v56  ;;  %v130_v59 = vsel %vm128_vm0, %v113_v56, %v115_v51  ;;  %v131_v60 = vsel %vm128_vm0, %v115_v51, %v117_v57  ;;  %v132_v63 = vsel %vm128_vm0, %v117_v57, %v963_v50 }
  0x8b   :  { %v295_v62 = vsel %vm289_vm2, %v809_v14, %v130_v59  ;;  %v298_v0 = vsel %vm289_vm2, %v798_v10, %v131_v60  ;;  %v292_v4 = vsel %vm289_vm2, %v801_v11, %v129_v58  ;;  %v301_v8 = vsel %vm289_vm2, %v818_v17, %v132_v63 }
  0x8c   :  { %v318_v1 = vsel %vm314_vm3, %v295_v62, %v166_v61  ;;  %v320_v14 = vsel %vm314_vm3, %v298_v0, %v167_v3 }
  0x8d   :  { %v980_v5 = vpop.permute.xlu0 %154  ;;  %v147_v6 = vpop.permute.xlu1 %146  ;;  %v336_v7 = vsel %vm331_vm4, %v318_v1, %v174_v30  ;;  %v339_v24 = vsel %vm331_vm4, %v320_v14, %v175_v25 }
  0x8e   :  { %v168_v12 = vsel %vm164_vm1, %v153_v55, %v980_v5  ;;  %v165_v13 = vsel %vm164_vm1, %v147_v6, %v149_v52  ;;  %467 = vmatprep.subr.bf16.mxu0 %v336_v7 }
  0x8f   :  { %v316_v11 = vsel %vm314_vm3, %v292_v4, %v165_v13  ;;  %v322_v15 = vsel %vm314_vm3, %v301_v8, %v168_v12 }
  0x90   :  { %v333_v18 = vsel %vm331_vm4, %v316_v11, %v173_v2  ;;  %v342_v19 = vsel %vm331_vm4, %v322_v15, %v176_v26 }
  0x91   :  { %v184_v21 = vpop.permute.xlu0 %183  ;;  %468 = vmatpush1.bf16.msra.mxu0 %v333_v18  ;;  %510 = vmatprep.subr.bf16.mxu1 %v342_v19  ;;  %v186_v23 = vpop.permute.xlu1 %185  ;;  %v1046_v19 = vld [vmem:[%s1167_s2] sm:$0xff]  }
  0x92   :  { %511 = vmatpush1.bf16.msra.mxu1 %v339_v24  ;;  %v200_v46 = vsel %vm128_vm0, %v184_v21, %v186_v23 }
  0x95   :  { %v188_v30 = vpop.permute.xlu0 %187  ;;  %v1000_v31 = vpop.permute.xlu1 %189 }
  0x96   :  { %v201_v52 = vsel %vm128_vm0, %v186_v23, %v188_v30  ;;  %v202_v53 = vsel %vm128_vm0, %v188_v30, %v1000_v31 }
  0x99   :  { %v211_v32 = vpop.permute.xlu0 %210  ;;  %v213_v36 = vpop.permute.xlu1 %212 }
  0x9a   :  { %v227_v42 = vsel %vm164_vm1, %v211_v32, %v213_v36 }
  0x9b   :  { %v361_v47 = vsel %vm289_vm2, %v200_v46, %v227_v42 }
  0x9c   :  { %v383_v55 = vsel %vm314_vm3, %v361_v47, %v818_v17 }
  0x9d   :  { %v215_v37 = vpop.permute.xlu0 %214  ;;  %v1002_v41 = vpop.permute.xlu1 %216 }
  0x9e   :  { %v228_v48 = vsel %vm164_vm1, %v213_v36, %v215_v37  ;;  %v229_v25 = vsel %vm164_vm1, %v215_v37, %v1002_v41 }
  0x9f   :  { %v364_v56 = vsel %vm289_vm2, %v201_v52, %v228_v48  ;;  %v367_v57 = vsel %vm289_vm2, %v202_v53, %v229_v25 }
  0xa0   :  { %v387_v17 = vsel %vm314_vm3, %v367_v57, %v841_v22  ;;  %v385_v1 = vsel %vm314_vm3, %v364_v56, %v141_v20 }
  0xa1   :  { %v182_v26 = vpop.permute.xlu0 %181  ;;  %v209_v45 = vpop.permute.xlu1 %208 }
  0xa2   :  { %v199_v59 = vsel %vm128_vm0, %v182_v26, %v184_v21  ;;  %v226_v60 = vsel %vm164_vm1, %v209_v45, %v211_v32 }
  0xa3   :  { %v358_v2 = vsel %vm289_vm2, %v199_v59, %v226_v60 }
  0xa4   :  { %v381_v12 = vsel %vm314_vm3, %v358_v2, %v139_v16 }
  0xa5   :  { %v240_v49 = vpop.permute.xlu0 %239  ;;  %v242_v51 = vpop.permute.xlu1 %241 }
  0xa6   :  { %v256_v54 = vsel %vm128_vm0, %v240_v49, %v242_v51 }
  0xa7   :  { %v400_v58 = vsel %vm331_vm4, %v383_v55, %v256_v54 }
  0xa8   :  { %469 = vmatprep.subr.bf16.mxu0 %v400_v58 }
  0xa9   :  { %v244_v61 = vpop.permute.xlu0 %243  ;;  %v1021_v62 = vpop.permute.xlu1 %245 }
  0xaa   :  { %v257_v63 = vsel %vm128_vm0, %v242_v51, %v244_v61  ;;  %v258_v0 = vsel %vm128_vm0, %v244_v61, %v1021_v62 }
  0xab   :  { %v406_v3 = vsel %vm331_vm4, %v387_v17, %v258_v0  ;;  %v403_v4 = vsel %vm331_vm4, %v385_v1, %v257_v63 }
  0xac   :  { %512 = vmatprep.subr.bf16.mxu1 %v406_v3 }
  0xad   :  { %v238_v6 = vpop.permute.xlu0 %237  ;;  %513 = vmatpush1.bf16.msra.mxu1 %v403_v4  ;;  %v264_v7 = vpop.permute.xlu1 %263 }
  0xae   :  { %v255_v8 = vsel %vm128_vm0, %v238_v6, %v240_v49 }
  0xaf   :  { %v397_v13 = vsel %vm331_vm4, %v381_v12, %v255_v8 }
  0xb0   :  { %470 = vmatpush1.bf16.msra.mxu0 %v397_v13 }
  0xb1   :  { %v266_v20 = vpop.permute.xlu0 %265  ;;  %v268_v14 = vpop.permute.xlu1 %267 }
  0xb2   :  { %v281_v11 = vsel %vm164_vm1, %v264_v7, %v266_v20  ;;  %v282_v15 = vsel %vm164_vm1, %v266_v20, %v268_v14 }
  0xb3   :  { %723 = vmatprep.subr.msk.bf16.mxu0 %vm289_vm2, %v282_v15  ;;  %v444_v18 = vsel %vm289_vm2, %v281_v11, 0 }
  0xb4   :  { %472 = vmatpush1.bf16.msra.mxu0 %v444_v18 }
  0xb5   :  { %v270_v10 = vpop.permute.xlu0 %269  ;;  %v1048_v16 = vpop.permute.xlu1 %271 }
  0xb6   :  { %v283_v21 = vsel %vm164_vm1, %v268_v14, %v270_v10  ;;  %v284_v23 = vsel %vm164_vm1, %v270_v10, %v1048_v16 }
  0xb7   :  { %725 = vmatprep.subr.msk.bf16.mxu1 %vm289_vm2, %v284_v23  ;;  %v450_v24 = vsel %vm289_vm2, %v283_v21, 0  ;;  %724 = vmatmul.mubr.msk.bf16.vlgmr.msra.gmra.mrb[0].mxu0 %vm439_vm5, %v1046_v19 }
  0xb8   :  { %515 = vmatpush1.bf16.msra.mxu1 %v450_v24  ;;  %585 = vmatprep.mubr.bf16.mxu0 %v760_v35 }
  0xb9   :  { %v121_v30 = vpop.permute.xlu0 %120  ;;  %v123_v32 = vpop.permute.xlu1 %122 }
  0xba   :  { %v133_v42 = vsel %vm128_vm0, %v963_v50, %v121_v30  ;;  %v134_v26 = vsel %vm128_vm0, %v121_v30, %v123_v32 }
  0xbb   :  { %726 = vmatmul.mubr.msk.bf16.vlgmr.msra.gmra.mrb[0].mxu1 %vm439_vm5, %v1046_v19  ;;  %v304_v47 = vsel %vm289_vm2, %v795_v9, %v133_v42  ;;  %v307_v48 = vsel %vm289_vm2, %v841_v22, %v134_v26 }
  0xbc   :  { %628 = vmatprep.mubr.bf16.mxu1 %v760_v35 }
  0xbd   :  { %v125_v36 = vpop.permute.xlu0 %124  ;;  %v127_v37 = vpop.permute.xlu1 %126 }
  0xbe   :  { %v135_v49 = vsel %vm128_vm0, %v123_v32, %v125_v36  ;;  %v136_v51 = vsel %vm128_vm0, %v125_v36, %v127_v37 }
  0xbf   :  { %v310_v55 = vsel %vm289_vm2, %v858_v27, %v135_v49  ;;  %v313_v56 = vsel %vm289_vm2, %v894_v33, %v136_v51 }
  0xc1   :  { %v157_v45 = vpop.permute.xlu0 %156  ;;  %v159_v46 = vpop.permute.xlu1 %158 }
  0xc2   :  { %v169_v25 = vsel %vm164_vm1, %v980_v5, %v157_v45  ;;  %v170_v35 = vsel %vm164_vm1, %v157_v45, %v159_v46 }
  0xc3   :  { %v324_v50 = vsel %vm314_vm3, %v304_v47, %v169_v25  ;;  %v326_v52 = vsel %vm314_vm3, %v307_v48, %v170_v35 }
  0xc4   :  { %v348_v9 = vsel %vm331_vm4, %v326_v52, %v178_v29  ;;  %v345_v53 = vsel %vm331_vm4, %v324_v50, %v177_v28 }
  0xc5   :  { %v161_v54 = vpop.permute.xlu0 %160  ;;  %553 = vmatprep.subr.bf16.mxu0 %v348_v9  ;;  %v163_v5 = vpop.permute.xlu1 %162 }
  0xc6   :  { %v171_v57 = vsel %vm164_vm1, %v159_v46, %v161_v54  ;;  %v172_v58 = vsel %vm164_vm1, %v161_v54, %v163_v5  ;;  %554 = vmatpush1.bf16.msra.mxu0 %v345_v53 }
  0xc7   :  { %v328_v29 = vsel %vm314_vm3, %v310_v55, %v171_v57  ;;  %v330_v22 = vsel %vm314_vm3, %v313_v56, %v172_v58 }
  0xc8   :  { %v354_v28 = vsel %vm331_vm4, %v330_v22, %v180_v44  ;;  %v351_v59 = vsel %vm331_vm4, %v328_v29, %v179_v43 }
  0xc9   :  { %v192_v60 = vpop.permute.xlu0 %191  ;;  %596 = vmatprep.subr.bf16.mxu1 %v354_v28  ;;  %v194_v61 = vpop.permute.xlu1 %193 }
  0xca   :  { %597 = vmatpush1.bf16.msra.mxu1 %v351_v59  ;;  %v203_v44 = vsel %vm128_vm0, %v1000_v31, %v192_v60  ;;  %v204_v43 = vsel %vm128_vm0, %v192_v60, %v194_v61 }
  0xcd   :  { %v196_v63 = vpop.permute.xlu0 %195  ;;  %v198_v0 = vpop.permute.xlu1 %197 }
  0xce   :  { %v205_v20 = vsel %vm128_vm0, %v194_v61, %v196_v63 }
  0xd1   :  { %v219_v17 = vpop.permute.xlu0 %218  ;;  %v221_v1 = vpop.permute.xlu1 %220 }
  0xd2   :  { %v230_v2 = vsel %vm164_vm1, %v1002_v41, %v219_v17  ;;  %v231_v3 = vsel %vm164_vm1, %v219_v17, %v221_v1  ;;  %v206_v41 = vsel %vm128_vm0, %v196_v63, %v198_v0 }
  0xd3   :  { %v370_v7 = vsel %vm289_vm2, %v203_v44, %v230_v2  ;;  %v373_v8 = vsel %vm289_vm2, %v204_v43, %v231_v3 }
  0xd4   :  { %v391_v18 = vsel %vm314_vm3, %v373_v8, %v894_v33  ;;  %v389_v10 = vsel %vm314_vm3, %v370_v7, %v143_v38 }
  0xd5   :  { %v223_v4 = vpop.permute.xlu0 %222  ;;  %v225_v6 = vpop.permute.xlu1 %224 }
  0xd6   :  { %v232_v12 = vsel %vm164_vm1, %v221_v1, %v223_v4  ;;  %v233_v13 = vsel %vm164_vm1, %v223_v4, %v225_v6 }
  0xd7   :  { %v376_v21 = vsel %vm289_vm2, %v205_v20, %v232_v12  ;;  %v379_v23 = vsel %vm289_vm2, %v206_v41, %v233_v13 }
  0xd8   :  { %v395_v27 = vsel %vm314_vm3, %v379_v23, %v927_v40  ;;  %v393_v38 = vsel %vm314_vm3, %v376_v21, %v145_v39 }
  0xd9   :  { %v248_v14 = vpop.permute.xlu0 %247  ;;  %v250_v11 = vpop.permute.xlu1 %249 }
  0xda   :  { %v259_v15 = vsel %vm128_vm0, %v1021_v62, %v248_v14  ;;  %v260_v31 = vsel %vm128_vm0, %v248_v14, %v250_v11 }
  0xdb   :  { %v412_v24 = vsel %vm331_vm4, %v391_v18, %v260_v31  ;;  %v409_v30 = vsel %vm331_vm4, %v389_v10, %v259_v15 }
  0xdc   :  { %555 = vmatprep.subr.bf16.mxu0 %v412_v24 }
  0xdd   :  { %v252_v32 = vpop.permute.xlu0 %251  ;;  %556 = vmatpush1.bf16.msra.mxu0 %v409_v30  ;;  %v254_v62 = vpop.permute.xlu1 %253 }
  0xde   :  { %v261_v36 = vsel %vm128_vm0, %v250_v11, %v252_v32  ;;  %v262_v33 = vsel %vm128_vm0, %v252_v32, %v254_v62 }
  0xdf   :  { %v418_v37 = vsel %vm331_vm4, %v395_v27, %v262_v33  ;;  %v415_v42 = vsel %vm331_vm4, %v393_v38, %v261_v36 }
  0xe0   :  { %598 = vmatprep.subr.bf16.mxu1 %v418_v37 }
  0xe1   :  { %v274_v26 = vpop.permute.xlu0 %273  ;;  %599 = vmatpush1.bf16.msra.mxu1 %v415_v42  ;;  %v276_v45 = vpop.permute.xlu1 %275 }
  0xe2   :  { %v285_v46 = vsel %vm164_vm1, %v1048_v16, %v274_v26  ;;  %v286_v47 = vsel %vm164_vm1, %v274_v26, %v276_v45 }
  0xe3   :  { %v456_v48 = vsel %vm289_vm2, %v285_v46, 0  ;;  %727 = vmatprep.subr.msk.bf16.mxu0 %vm289_vm2, %v286_v47 }
  0xe4   :  { %558 = vmatpush1.bf16.msra.mxu0 %v456_v48 }
  0xe5   :  { %v278_v34 = vpop.permute.xlu0 %277  ;;  %v280_v39 = vpop.permute.xlu1 %279 }
  0xe6   :  { %v287_v40 = vsel %vm164_vm1, %v276_v45, %v278_v34  ;;  %v288_v25 = vsel %vm164_vm1, %v278_v34, %v280_v39 }
  0xe7   :  { %v462_v35 = vsel %vm289_vm2, %v287_v40, 0  ;;  %729 = vmatprep.subr.msk.bf16.mxu1 %vm289_vm2, %v288_v25  ;;  %728 = vmatmul.mubr.msk.bf16.vlgmr.msra.gmra.mrb[4].mxu0 %vm439_vm5, %v1046_v19 }
  0xe8   :  { %601 = vmatpush1.bf16.msra.mxu1 %v462_v35 }
  0xeb   :  { %730 = vmatmul.mubr.msk.bf16.vlgmr.msra.gmra.mrb[4].mxu1 %vm439_vm5, %v1046_v19 }
  0xf6   :  { %v427_v16 = vpop.permute.xlu0 %426  ;;  %v432_v51 = vpop.permute.xlu1 %431 }
 0x18a   :  { %v501_v49 = vpop.f32.mrb[0].mxu0 }
 0x18b   :  { %v503_v50 = vpop.f32.mrb[1].mxu0  ;;  %v502_v52 = vadd.f32 %v501_v49, %v427_v16 }
 0x18c   :  { %v505_v9 = vpop.f32.mrb[2].mxu0  ;;  %v504_v53 = vadd.f32 %v503_v50, %v427_v16 }
 0x18d   :  { %v639_v54 = vmax.f32 %v502_v52, 0.0  ;;  %v507_v5 = vpop.f32.mrb[3].mxu0  ;;  %v506_v55 = vadd.f32 %v505_v9, %v432_v51 }
 0x18e   :  { %v544_v56 = vpop.f32.mrb[0].mxu1  ;;  %v640_v57 = vmax.f32 %v504_v53, 0.0  ;;  %v508_v58 = vadd.f32 %v507_v5, %v432_v51 }
 0x18f   :  { %v546_v29 = vpop.f32.mrb[1].mxu1  ;;  %v545_v22 = vadd.f32 %v544_v56, %v427_v16  ;;  %v647_v28 = vmax.f32 %v506_v55, 0.0 }
 0x190   :  { %v548_v59 = vpop.f32.mrb[2].mxu1  ;;  %v547_v60 = vadd.f32 %v546_v29, %v427_v16  ;;  %v739_v61 = vpack.c.bf16 %v640_v57, %v639_v54  ;;  %v648_v19 = vmax.f32 %v508_v58, 0.0 }
 0x191   :  { %v641_v63 = vmax.f32 %v545_v22, 0.0  ;;  %v550_v0 = vpop.f32.mrb[3].mxu1  ;;  %v549_v17 = vadd.f32 %v548_v59, %v432_v51 }
 0x192   :  { %v642_v1 = vmax.f32 %v547_v60, 0.0  ;;  %703 = vst [vmem:[%s1169_s4] sm:$0xff] %v739_v61  ;;  %v551_v2 = vadd.f32 %v550_v0, %v432_v51  ;;  %v743_v3 = vpack.c.bf16 %v648_v19, %v647_v28 }
 0x193   :  { %v649_v4 = vmax.f32 %v549_v17, 0.0 }
 0x194   :  { %v740_v6 = vpack.c.bf16 %v642_v1, %v641_v63  ;;  %v650_v44 = vmax.f32 %v551_v2, 0.0  ;;  %707 = vst [vmem:[%s1169_s4 + $0x20] sm:$0xff] %v743_v3 }
 0x196   :  { %704 = vst [vmem:[%s1169_s4 + $0x8] sm:$0xff] %v740_v6  ;;  %v744_v43 = vpack.c.bf16 %v650_v44, %v649_v4 }
 0x198   :  { %708 = vst [vmem:[%s1169_s4 + $0x28] sm:$0xff] %v744_v43 }
 0x1ba   :  { %v587_v7 = vpop.f32.mrb[4].mxu0 }
 0x1bb   :  { %v588_v8 = vadd.f32 %v587_v7, %v427_v16  ;;  %v589_v12 = vpop.f32.mrb[5].mxu0 }
 0x1bc   :  { %v590_v13 = vadd.f32 %v589_v12, %v427_v16  ;;  %v591_v20 = vpop.f32.mrb[6].mxu0 }
 0x1bd   :  { %v643_v41 = vmax.f32 %v588_v8, 0.0  ;;  %v592_v14 = vadd.f32 %v591_v20, %v432_v51  ;;  %v593_v11 = vpop.f32.mrb[7].mxu0 }
 0x1be   :  { %v644_v15 = vmax.f32 %v590_v13, 0.0  ;;  %v594_v31 = vadd.f32 %v593_v11, %v432_v51  ;;  %v630_v18 = vpop.f32.mrb[4].mxu1 }
 0x1bf   :  { %v651_v10 = vmax.f32 %v592_v14, 0.0  ;;  %v631_v21 = vadd.f32 %v630_v18, %v427_v16  ;;  %v632_v23 = vpop.f32.mrb[5].mxu1 }
 0x1c0   :  { %v741_v24 = vpack.c.bf16 %v644_v15, %v643_v41  ;;  %v652_v30 = vmax.f32 %v594_v31, 0.0  ;;  %v633_v32 = vadd.f32 %v632_v23, %v427_v16  ;;  %v634_v62 = vpop.f32.mrb[6].mxu1 }
 0x1c1   :  { %v645_v36 = vmax.f32 %v631_v21, 0.0  ;;  %v635_v33 = vadd.f32 %v634_v62, %v432_v51  ;;  %v636_v27 = vpop.f32.mrb[7].mxu1 }
 0x1c2   :  { %705 = vst [vmem:[%s1169_s4 + $0x10] sm:$0xff] %v741_v24  ;;  %v745_v38 = vpack.c.bf16 %v652_v30, %v651_v10  ;;  %v646_v37 = vmax.f32 %v633_v32, 0.0  ;;  %v637_v42 = vadd.f32 %v636_v27, %v432_v51 }
 0x1c3   :  { %v653_v26 = vmax.f32 %v635_v33, 0.0 }
 0x1c4   :  { %709 = vst [vmem:[%s1169_s4 + $0x30] sm:$0xff] %v745_v38  ;;  %v742_v45 = vpack.c.bf16 %v646_v37, %v645_v36  ;;  %v654_v46 = vmax.f32 %v637_v42, 0.0 }
 0x1c6   :  { %706 = vst [vmem:[%s1169_s4 + $0x18] sm:$0xff] %v742_v45  ;;  %v746_v47 = vpack.c.bf16 %v654_v46, %v653_v26 }
 0x1c8   :  { %710 = vst [vmem:[%s1169_s4 + $0x38] sm:$0xff] %v746_v47 }

// kernel: model_forward.3
= control target key start
LH: loop header
LB: loop body
LE: loop exit
PB: predicated region body
PF: predicated region fallthrough
CT: control target
= control target key end

     0   :  { %s1398_s15 = smov 0   ;;  %s1400_s16 = smov 0   ;;  %s1861_s0 = inlined_call_operand.vmem [shape: bf16[2,3,4,1536], index: 0, kind: input, shape index: {}, may-alias: {0,1}]   ;;  %s1862_s1 = inlined_call_operand.vmem [shape: bf16[2,3,4,1536], index: 1, kind: input, shape index: {}, may-alias: {0,1}]   ;;  %s1863_s2 = inlined_call_operand.vmem [shape: bf16[16,36], index: 2, kind: input, shape index: {}]   ;;  %s1864_s3 = inlined_call_operand.vmem [shape: f32[16,1], index: 3, kind: input, shape index: {}]   ;;  %s1865_s4 = inlined_call_operand.vmem [shape: bf16[2,16,1024], index: 4, kind: output, shape index: {}]  }
   0x1   :  { %s1402_s17 = smov 0   ;;  %s1404_s18 = smov 0  }
   0x2   :  { %s1406_s19 = smov 0  }
   0x3 LB: > { %s26_s20 = sadd.s32 1, %s1358_s17  ;;  %s33_s21 = sadd.s32 1, %s1362_s18  ;;  %s1366_s19 = sphi %s1406_s19, %s14_s19   ;;  %s1362_s18 = sphi %s1404_s18, %s1869_s18   ;;  %s1358_s17 = sphi %s1402_s17, %s1868_s17   ;;  %s1354_s16 = sphi %s1400_s16, %s1867_s16   ;;  %s1350_s15 = sphi %s1398_s15, %s1866_s15  }
   0x4   : > { %p27_p0 = scmp.ge.s32.totalorder %s26_s20, 3  ;;  %p1240_p1 = scmp.ge.s32.totalorder %s1366_s19, 1 }
   0x5   : > { %p235_p2 = scmp.lt.s32.totalorder %s1366_s19, 7 }
   0x6   : > { %s1871_s20 = smov (%p27_p0, %s26_s20), 0  ;;  %s1873_s21 = smov (!%p27_p0, %s33_s21), %s1362_s18 }
   0x7   : > { %p236_p3 = pnand %p1240_p1, %p235_p2  ;;  %p35_p4 = scmp.ge.s32.totalorder %s1873_s21, 2 }
   0x8   : > { %p297_p5 = scmp.lt.s32.totalorder (!%p236_p3), %s1354_s16, 1  ;;  %p299_p6 = scmp.lt.s32.totalorder (!%p236_p3), %s1350_s15, 2  ;;  %v352_v0 = vlaneseq (!%p236_p3)  ;;  %v1368_v1 = vmov (!%p236_p3), 1983009808   ;;  %v1371_v37 = vmov (!%p236_p3), 0   ;;  %v720_v48 = vld [vmem:[%s1864_s3] sm:$0xff] (!%p236_p3) }
   0x9   : > { %s1875_s21 = smov (%p35_p4, %s1873_s21), 0  ;;  %239 = sbr.rel (%p236_p3) target bundleno = 495 (0x1ef), region = 36 }
   0xa   : > { %v350_v2 = vunpack.c.l.s4 (!%p236_p3), %v1368_v1  ;;  %v353_v4 = vshrl.u32 (!%p236_p3), %v352_v0, 7  ;;  %s1369_s14 = smov (!%p236_p3), 127   ;;  %797 = vmatprep.mubr.bf16.mxu0 (!%p236_p3), %v1371_v37  ;;  %840 = vmatprep.mubr.bf16.mxu1 (!%p236_p3), %v1371_v37  ;;  %v721_v49 = vld [vmem:[%s1864_s3 + $0x8] sm:$0xff] (!%p236_p3)  ;;  %vm426_vm0 = vcmask (!%p236_p3), 1039360   ;;  %vm462_vm1 = vcmask (!%p236_p3), 1031168   ;;  %p1254_p7 = scmp.ne.s32.totalorder (!%p236_p3), %s1350_s15, 0 }
   0xb   : > { %1323 = vset.pattern.permute.xlu1 (!%p236_p3), %v1371_v37  ;;  %1322 = vset.pattern.permute.xlu0 (!%p236_p3), %v1371_v37  ;;  %vm587_vm2 = vcmask (!%p236_p3), 1041408   ;;  %vm612_vm3 = vcmask (!%p236_p3), 1043456   ;;  %vm629_vm4 = vcmask (!%p236_p3), 1045504   ;;  %vm737_vm5 = vcmask (!%p236_p3), 293888  }
   0xc   : > { %v351_v3 = vunpack.c.0.s8 (!%p236_p3), %v350_v2 }
   0xe   : > { %v354_v5 = vsub.s32 (!%p236_p3), %v351_v3, %v353_v4 }
  0x10   : > { %s1877_s16 = smov (!%p297_p5, %s1354_s16), 1 }
  0x11   : > { %s300_s22 = scalar_select %p299_p6, %s1350_s15, 2 }
  0x12   : > { %s1276_s23 = smul.u32 36, %s1877_s16  ;;  %s1266_s24 = sshll.u32 %s1877_s16, 6 }
  0x13   : > { %s1275_s25 = smul.u32 12, %s300_s22  ;;  %s1435_s28 = scalar_lea.vmem %s1865_s4, %s1266_s24 }
  0x14   : > { %s1370_s16 = smov 126  }
  0x15   : > { %s306_s29 = sadd.s32 %s1276_s23, %s1275_s25  ;;  %s324_s30 = sadd.s32 8, %s1275_s25 }
  0x16   : > { %s1241_s5 = sshll.u32 %s306_s29, 1  ;;  %s326_s6 = sadd.s32 %s1276_s23, %s324_s30 }
  0x17   : > { %s308_s9 = scalar_lea.vmem %s1861_s0, %s1241_s5  ;;  %s1242_s10 = sshll.u32 %s326_s6, 1 }
  0x18   : > { %v344_v6 = vld [vmem:[%s308_s9 + $0x8] sm:$0xff]  ;;  %v343_v7 = vld [vmem:[%s308_s9] sm:$0xff]  ;;  %s328_s13 = scalar_lea.vmem %s1862_s1, %s1242_s10 }
  0x19   : > { %v1443_v8 = vrot.slane %v344_v6, %v354_v5  ;;  %v1445_v9 = vrot.slane %v343_v7, %v354_v5  ;;  %v345_v10 = vld [vmem:[%s328_s13] sm:$0xff]  ;;  %v348_v14 = vcombine.high %v343_v7, %v343_v7  ;;  %v365_v28 = vcombine.high %v344_v6, %v344_v6 }
  0x1a   : > { %v1447_v11 = vrot.slane %v345_v10, %v354_v5  ;;  %v383_v17 = vcombine.high %v345_v10, %v345_v10 }
  0x1b   : > { %v403_v12 = vrot.slane %v1443_v8, 6  ;;  %v399_v13 = vrot.slane %v1445_v9, 6  ;;  %v439_v15 = vrot.slane %v1443_v8, 4  ;;  %v1456_v16 = vcombine.high %v1445_v9, %v1445_v9 }
  0x1c   : > { %v1458_v18 = vrot.slane %v348_v14, %v354_v5  ;;  %v435_v19 = vrot.slane %v1445_v9, 4  ;;  %v1467_v21 = vrot.slane %v383_v17, %v354_v5  ;;  %v1491_v26 = vcombine.high %v1443_v8, %v1443_v8 }
  0x1d   : > { %416 = vrot.lane.b32.xlu1 %v403_v12, %s1369_s14  ;;  %408 = vrot.lane.b32.xlu0 %v399_v13, %s1369_s14  ;;  %v400_v20 = vrot.slane %v1456_v16, 6  ;;  %v474_v30 = vrot.slane %v1443_v8, 2  ;;  %v1507_v31 = vrot.slane %v365_v28, %v354_v5  ;;  %v407_v39 = vrot.slane %v1447_v11, 6 }
  0x1e   : > { %v401_v22 = vrot.slane %v1458_v18, 6  ;;  %v1474_v23 = vcombine.high %v1458_v18, %v1458_v18  ;;  %v437_v24 = vrot.slane %v1458_v18, 4  ;;  %v404_v27 = vrot.slane %v1491_v26, 6 }
  0x1f   : > { %v475_v32 = vrot.slane %v1491_v26, 2  ;;  %v476_v33 = vrot.slane %v1507_v31, 2  ;;  %v472_v34 = vrot.slane %v1458_v18, 2  ;;  %v405_v35 = vrot.slane %v1507_v31, 6 }
  0x20   : > { %v402_v25 = vrot.slane %v1474_v23, 6  ;;  %v473_v29 = vrot.slane %v1474_v23, 2  ;;  %v1540_v36 = vcombine.high %v1507_v31, %v1507_v31  ;;  %v441_v40 = vrot.slane %v1507_v31, 4 }
  0x21   : > { %452 = vrot.lane.b32.xlu0 %v439_v15, %s1370_s16  ;;  %446 = vrot.lane.b32.xlu1 %v1456_v16, %s1370_s16  ;;  %v443_v41 = vrot.slane %v1447_v11, 4  ;;  %v1570_v42 = vcombine.high %v1447_v11, %v1447_v11  ;;  %v478_v45 = vrot.slane %v1447_v11, 2  ;;  %v534_v47 = vrot.slane %v1467_v21, 2 }
  0x22   : > { %v406_v38 = vrot.slane %v1540_v36, 6  ;;  %v477_v44 = vrot.slane %v1540_v36, 2  ;;  %v471_v1 = vrot.slane %v1456_v16, 2 }
  0x23   : > { %v505_v43 = vrot.slane %v1570_v42, 6  ;;  %v533_v46 = vrot.slane %v1570_v42, 2 }
  0x25   : > { %444 = vrot.lane.b32.xlu1 %v435_v19, %s1370_s16  ;;  %410 = vrot.lane.b32.xlu0 %v400_v20, %s1369_s14 }
  0x29   : > { %412 = vrot.lane.b32.xlu0 %v401_v22, %s1369_s14  ;;  %450 = vrot.lane.b32.xlu1 %v1474_v23, %s1370_s16 }
  0x2d   : > { %448 = vrot.lane.b32.xlu0 %v437_v24, %s1370_s16  ;;  %414 = vrot.lane.b32.xlu1 %v402_v25, %s1369_s14 }
  0x31   : > { %481 = vrot.lane.b32.xlu0 %v1458_v18, %s1369_s14  ;;  %483 = vrot.lane.b32.xlu1 %v1474_v23, %s1369_s14 }
  0x35   : > { %485 = vrot.lane.b32.xlu0 %v1443_v8, %s1369_s14  ;;  %487 = vrot.lane.b32.xlu1 %v1491_v26, %s1369_s14 }
  0x39   : > { %508 = vrot.lane.b32.xlu0 %v401_v22, %s1370_s16  ;;  %510 = vrot.lane.b32.xlu1 %v402_v25, %s1370_s16 }
  0x3d   : > { %512 = vrot.lane.b32.xlu0 %v403_v12, %s1370_s16  ;;  %514 = vrot.lane.b32.xlu1 %v404_v27, %s1370_s16 }
  0x41   : > { %479 = vrot.lane.b32.xlu0 %v1456_v16, %s1369_s14  ;;  %506 = vrot.lane.b32.xlu1 %v400_v20, %s1370_s16 }
  0x45   : > { %537 = vrot.lane.b32.xlu0 %v473_v29, %s1369_s14  ;;  %539 = vrot.lane.b32.xlu1 %v474_v30, %s1369_s14 }
  0x49   : > { %541 = vrot.lane.b32.xlu0 %v475_v32, %s1369_s14  ;;  %543 = vrot.lane.b32.xlu1 %v476_v33, %s1369_s14 }
  0x4d   : > { %535 = vrot.lane.b32.xlu0 %v472_v34, %s1369_s14  ;;  %561 = vrot.lane.b32.xlu1 %v1458_v18, %s1370_s16 }
  0x51   : > { %563 = vrot.lane.b32.xlu0 %v1474_v23, %s1370_s16  ;;  %565 = vrot.lane.b32.xlu1 %v1443_v8, %s1370_s16 }
  0x55   : > { %567 = vrot.lane.b32.xlu0 %v1491_v26, %s1370_s16  ;;  %569 = vrot.lane.b32.xlu1 %v1507_v31, %s1370_s16 }
  0x59   : > { %418 = vrot.lane.b32.xlu0 %v404_v27, %s1369_s14  ;;  %420 = vrot.lane.b32.xlu1 %v405_v35, %s1369_s14 }
  0x5d   : > { %422 = vrot.lane.b32.xlu0 %v406_v38, %s1369_s14  ;;  %424 = vrot.lane.b32.xlu1 %v407_v39, %s1369_s14 }
  0x61   : > { %454 = vrot.lane.b32.xlu0 %v1491_v26, %s1370_s16  ;;  %456 = vrot.lane.b32.xlu1 %v441_v40, %s1370_s16 }
  0x65   : > { %458 = vrot.lane.b32.xlu0 %v1540_v36, %s1370_s16  ;;  %460 = vrot.lane.b32.xlu1 %v443_v41, %s1370_s16 }
  0x69   : > { %489 = vrot.lane.b32.xlu0 %v1507_v31, %s1369_s14  ;;  %491 = vrot.lane.b32.xlu1 %v1540_v36, %s1369_s14 }
  0x6d   : > { %493 = vrot.lane.b32.xlu0 %v1447_v11, %s1369_s14  ;;  %495 = vrot.lane.b32.xlu1 %v1570_v42, %s1369_s14 }
  0x71   : > { %516 = vrot.lane.b32.xlu0 %v405_v35, %s1370_s16  ;;  %518 = vrot.lane.b32.xlu1 %v406_v38, %s1370_s16 }
  0x75   : > { %520 = vrot.lane.b32.xlu0 %v407_v39, %s1370_s16  ;;  %522 = vrot.lane.b32.xlu1 %v505_v43, %s1370_s16 }
  0x79   : > { %545 = vrot.lane.b32.xlu0 %v477_v44, %s1369_s14  ;;  %547 = vrot.lane.b32.xlu1 %v478_v45, %s1369_s14 }
  0x7d   : > { %549 = vrot.lane.b32.xlu0 %v533_v46, %s1369_s14  ;;  %551 = vrot.lane.b32.xlu1 %v534_v47, %s1369_s14 }
  0x81   : > { %571 = vrot.lane.b32.xlu0 %v1540_v36, %s1370_s16  ;;  %573 = vrot.lane.b32.xlu1 %v1447_v11, %s1370_s16 }
  0x85   : > { %575 = vrot.lane.b32.xlu0 %v1570_v42, %s1370_s16  ;;  %577 = vrot.lane.b32.xlu1 %v1467_v21, %s1370_s16 }
  0x89   : > { %724 = vperm.xlu0 %1322, %v720_v48   ;;  %729 = vperm.xlu1 %1323, %v721_v49  }
  0x8f   : > { %v1607_v50 = vpop.permute.xlu1 %416  ;;  %v409_v51 = vpop.permute.xlu0 %408 }
  0x93   : > { %v1609_v52 = vpop.permute.xlu0 %452  ;;  %v447_v53 = vpop.permute.xlu1 %446 }
  0x97   : > { %v445_v54 = vpop.permute.xlu1 %444  ;;  %v411_v55 = vpop.permute.xlu0 %410 }
  0x98   : > { %v427_v56 = vsel %vm426_vm0, %v409_v51, %v411_v55  ;;  %v463_v59 = vsel %vm462_vm1, %v445_v54, %v447_v53 }
  0x99   : > { %v590_v60 = vsel %vm587_vm2, %v1445_v9, %v427_v56 }
  0x9a   : > { %v614_v2 = vsel %vm612_vm3, %v590_v60, %v463_v59 }
  0x9b   : > { %v413_v57 = vpop.permute.xlu0 %412  ;;  %v451_v58 = vpop.permute.xlu1 %450  ;;  %v631_v20 = vsel %vm629_vm4, %v614_v2, %v471_v1 }
  0x9c   : > { %v428_v61 = vsel %vm426_vm0, %v411_v55, %v413_v57  ;;  %v466_v7 = vsel %vm462_vm1, %v451_v58, %v1609_v52 }
  0x9d   : > { %v593_v62 = vsel %vm587_vm2, %v1456_v16, %v428_v61 }
  0x9f   : > { %v449_v63 = vpop.permute.xlu0 %448  ;;  %v415_v0 = vpop.permute.xlu1 %414 }
  0xa0   : > { %v464_v3 = vsel %vm462_vm1, %v447_v53, %v449_v63  ;;  %v465_v4 = vsel %vm462_vm1, %v449_v63, %v451_v58  ;;  %v429_v5 = vsel %vm426_vm0, %v413_v57, %v415_v0  ;;  %v430_v6 = vsel %vm426_vm0, %v415_v0, %v1607_v50 }
  0xa1   : > { %v596_v9 = vsel %vm587_vm2, %v1458_v18, %v429_v5  ;;  %v599_v10 = vsel %vm587_vm2, %v1474_v23, %v430_v6  ;;  %v616_v12 = vsel %vm612_vm3, %v593_v62, %v464_v3 }
  0xa2   : > { %v634_v13 = vsel %vm629_vm4, %v616_v12, %v472_v34  ;;  %v620_v14 = vsel %vm612_vm3, %v599_v10, %v466_v7  ;;  %v618_v16 = vsel %vm612_vm3, %v596_v9, %v465_v4 }
  0xa3   : > { %765 = vmatprep.subr.bf16.mxu0 %v634_v13  ;;  %v482_v17 = vpop.permute.xlu0 %481  ;;  %v484_v19 = vpop.permute.xlu1 %483  ;;  %v640_v21 = vsel %vm629_vm4, %v620_v14, %v474_v30  ;;  %v637_v22 = vsel %vm629_vm4, %v618_v16, %v473_v29 }
  0xa4   : > { %766 = vmatpush1.bf16.msra.mxu0 %v631_v20  ;;  %808 = vmatprep.subr.bf16.mxu1 %v640_v21  ;;  %v498_v30 = vsel %vm426_vm0, %v482_v17, %v484_v19 }
  0xa5   : > { %809 = vmatpush1.bf16.msra.mxu1 %v637_v22 }
  0xa7   : > { %v486_v25 = vpop.permute.xlu0 %485  ;;  %v1644_v27 = vpop.permute.xlu1 %487 }
  0xa8   : > { %v499_v53 = vsel %vm426_vm0, %v484_v19, %v486_v25  ;;  %v500_v54 = vsel %vm426_vm0, %v486_v25, %v1644_v27  ;;  %v1690_v19 = vld [vmem:[%s1863_s2] sm:$0xff]  }
  0xab   : > { %v509_v28 = vpop.permute.xlu0 %508  ;;  %v511_v34 = vpop.permute.xlu1 %510 }
  0xac   : > { %v525_v39 = vsel %vm462_vm1, %v509_v28, %v511_v34 }
  0xad   : > { %v659_v47 = vsel %vm587_vm2, %v498_v30, %v525_v39 }
  0xae   : > { %v681_v56 = vsel %vm612_vm3, %v659_v47, %v1474_v23 }
  0xaf   : > { %v513_v35 = vpop.permute.xlu0 %512  ;;  %v1646_v38 = vpop.permute.xlu1 %514 }
  0xb0   : > { %v526_v29 = vsel %vm462_vm1, %v511_v34, %v513_v35  ;;  %v527_v48 = vsel %vm462_vm1, %v513_v35, %v1646_v38 }
  0xb1   : > { %v662_v57 = vsel %vm587_vm2, %v499_v53, %v526_v29  ;;  %v665_v58 = vsel %vm587_vm2, %v500_v54, %v527_v48 }
  0xb2   : > { %v685_v23 = vsel %vm612_vm3, %v665_v58, %v1491_v26  ;;  %v683_v2 = vsel %vm612_vm3, %v662_v57, %v439_v15 }
  0xb3   : > { %v480_v43 = vpop.permute.xlu0 %479  ;;  %v507_v46 = vpop.permute.xlu1 %506 }
  0xb4   : > { %v497_v60 = vsel %vm426_vm0, %v480_v43, %v482_v17  ;;  %v524_v61 = vsel %vm462_vm1, %v507_v46, %v509_v28 }
  0xb5   : > { %v656_v3 = vsel %vm587_vm2, %v497_v60, %v524_v61 }
  0xb6   : > { %v679_v10 = vsel %vm612_vm3, %v656_v3, %v437_v24 }
  0xb7   : > { %v538_v49 = vpop.permute.xlu0 %537  ;;  %v540_v51 = vpop.permute.xlu1 %539 }
  0xb8   : > { %v554_v55 = vsel %vm426_vm0, %v538_v49, %v540_v51 }
  0xb9   : > { %v698_v59 = vsel %vm629_vm4, %v681_v56, %v554_v55 }
  0xba   : > { %767 = vmatprep.subr.bf16.mxu0 %v698_v59 }
  0xbb   : > { %v542_v62 = vpop.permute.xlu0 %541  ;;  %v1665_v63 = vpop.permute.xlu1 %543 }
  0xbc   : > { %v555_v0 = vsel %vm426_vm0, %v540_v51, %v542_v62  ;;  %v556_v1 = vsel %vm426_vm0, %v542_v62, %v1665_v63 }
  0xbd   : > { %v704_v4 = vsel %vm629_vm4, %v685_v23, %v556_v1  ;;  %v701_v5 = vsel %vm629_vm4, %v683_v2, %v555_v0 }
  0xbe   : > { %810 = vmatprep.subr.bf16.mxu1 %v704_v4 }
  0xbf   : > { %v536_v6 = vpop.permute.xlu0 %535  ;;  %811 = vmatpush1.bf16.msra.mxu1 %v701_v5  ;;  %v562_v7 = vpop.permute.xlu1 %561 }
  0xc0   : > { %v553_v9 = vsel %vm426_vm0, %v536_v6, %v538_v49 }
  0xc1   : > { %v695_v12 = vsel %vm629_vm4, %v679_v10, %v553_v9 }
  0xc2   : > { %768 = vmatpush1.bf16.msra.mxu0 %v695_v12 }
  0xc3   : > { %v564_v15 = vpop.permute.xlu0 %563  ;;  %v566_v13 = vpop.permute.xlu1 %565 }
  0xc4   : > { %v579_v14 = vsel %vm462_vm1, %v562_v7, %v564_v15  ;;  %v580_v16 = vsel %vm462_vm1, %v564_v15, %v566_v13 }
  0xc5   : > { %1246 = vmatprep.subr.msk.bf16.mxu0 %vm587_vm2, %v580_v16  ;;  %v742_v17 = vsel %vm587_vm2, %v579_v14, 0 }
  0xc6   : > { %770 = vmatpush1.bf16.msra.mxu0 %v742_v17 }
  0xc7   : > { %v568_v18 = vpop.permute.xlu0 %567  ;;  %v1692_v24 = vpop.permute.xlu1 %569 }
  0xc8   : > { %v581_v20 = vsel %vm462_vm1, %v566_v13, %v568_v18  ;;  %v582_v21 = vsel %vm462_vm1, %v568_v18, %v1692_v24 }
  0xc9   : > { %1248 = vmatprep.subr.msk.bf16.mxu1 %vm587_vm2, %v582_v21  ;;  %v748_v22 = vsel %vm587_vm2, %v581_v20, 0  ;;  %1247 = vmatmul.mubr.msk.bf16.vlgmr.msra.gmra.mrb[0].mxu0 %vm737_vm5, %v1690_v19 }
  0xca   : > { %813 = vmatpush1.bf16.msra.mxu1 %v748_v22  ;;  %883 = vmatprep.mubr.bf16.mxu0 %v1371_v37 }
  0xcb   : > { %v419_v25 = vpop.permute.xlu0 %418  ;;  %v421_v28 = vpop.permute.xlu1 %420 }
  0xcc   : > { %v431_v39 = vsel %vm426_vm0, %v1607_v50, %v419_v25  ;;  %v432_v43 = vsel %vm426_vm0, %v419_v25, %v421_v28 }
  0xcd   : > { %1249 = vmatmul.mubr.msk.bf16.vlgmr.msra.gmra.mrb[0].mxu1 %vm737_vm5, %v1690_v19  ;;  %v602_v47 = vsel %vm587_vm2, %v1443_v8, %v431_v39  ;;  %v605_v29 = vsel %vm587_vm2, %v1491_v26, %v432_v43 }
  0xce   : > { %926 = vmatprep.mubr.bf16.mxu1 %v1371_v37 }
  0xcf   : > { %v423_v34 = vpop.permute.xlu0 %422  ;;  %v425_v35 = vpop.permute.xlu1 %424 }
  0xd0   : > { %v433_v49 = vsel %vm426_vm0, %v421_v28, %v423_v34  ;;  %v434_v51 = vsel %vm426_vm0, %v423_v34, %v425_v35 }
  0xd1   : > { %v608_v56 = vsel %vm587_vm2, %v1507_v31, %v433_v49  ;;  %v611_v57 = vsel %vm587_vm2, %v1540_v36, %v434_v51 }
  0xd3   : > { %v455_v46 = vpop.permute.xlu0 %454  ;;  %v457_v30 = vpop.permute.xlu1 %456 }
  0xd4   : > { %v467_v48 = vsel %vm462_vm1, %v1609_v52, %v455_v46  ;;  %v468_v37 = vsel %vm462_vm1, %v455_v46, %v457_v30 }
  0xd5   : > { %v622_v50 = vsel %vm612_vm3, %v602_v47, %v467_v48  ;;  %v624_v53 = vsel %vm612_vm3, %v605_v29, %v468_v37 }
  0xd6   : > { %v646_v8 = vsel %vm629_vm4, %v624_v53, %v476_v33  ;;  %v643_v54 = vsel %vm629_vm4, %v622_v50, %v475_v32 }
  0xd7   : > { %v459_v55 = vpop.permute.xlu0 %458  ;;  %851 = vmatprep.subr.bf16.mxu0 %v646_v8  ;;  %v461_v52 = vpop.permute.xlu1 %460 }
  0xd8   : > { %v469_v58 = vsel %vm462_vm1, %v457_v30, %v459_v55  ;;  %v470_v59 = vsel %vm462_vm1, %v459_v55, %v461_v52  ;;  %852 = vmatpush1.bf16.msra.mxu0 %v643_v54 }
  0xd9   : > { %v626_v33 = vsel %vm612_vm3, %v608_v56, %v469_v58  ;;  %v628_v26 = vsel %vm612_vm3, %v611_v57, %v470_v59 }
  0xda   : > { %v652_v32 = vsel %vm629_vm4, %v628_v26, %v478_v45  ;;  %v649_v60 = vsel %vm629_vm4, %v626_v33, %v477_v44 }
  0xdb   : > { %v490_v61 = vpop.permute.xlu0 %489  ;;  %894 = vmatprep.subr.bf16.mxu1 %v652_v32  ;;  %v492_v62 = vpop.permute.xlu1 %491 }
  0xdc   : > { %895 = vmatpush1.bf16.msra.mxu1 %v649_v60  ;;  %v501_v45 = vsel %vm426_vm0, %v1644_v27, %v490_v61  ;;  %v502_v44 = vsel %vm426_vm0, %v490_v61, %v492_v62 }
  0xdf   : > { %v494_v0 = vpop.permute.xlu0 %493  ;;  %v496_v1 = vpop.permute.xlu1 %495 }
  0xe0   : > { %v503_v15 = vsel %vm426_vm0, %v492_v62, %v494_v0 }
  0xe3   : > { %v517_v23 = vpop.permute.xlu0 %516  ;;  %v519_v2 = vpop.permute.xlu1 %518 }
  0xe4   : > { %v528_v3 = vsel %vm462_vm1, %v1646_v38, %v517_v23  ;;  %v529_v4 = vsel %vm462_vm1, %v517_v23, %v519_v2  ;;  %v504_v38 = vsel %vm426_vm0, %v494_v0, %v496_v1 }
  0xe5   : > { %v668_v7 = vsel %vm587_vm2, %v501_v45, %v528_v3  ;;  %v671_v9 = vsel %vm587_vm2, %v502_v44, %v529_v4 }
  0xe6   : > { %v689_v17 = vsel %vm612_vm3, %v671_v9, %v1540_v36  ;;  %v687_v18 = vsel %vm612_vm3, %v668_v7, %v441_v40 }
  0xe7   : > { %v521_v5 = vpop.permute.xlu0 %520  ;;  %v523_v6 = vpop.permute.xlu1 %522 }
  0xe8   : > { %v530_v10 = vsel %vm462_vm1, %v519_v2, %v521_v5  ;;  %v531_v12 = vsel %vm462_vm1, %v521_v5, %v523_v6 }
  0xe9   : > { %v674_v20 = vsel %vm587_vm2, %v503_v15, %v530_v10  ;;  %v677_v21 = vsel %vm587_vm2, %v504_v38, %v531_v12 }
  0xea   : > { %v693_v31 = vsel %vm612_vm3, %v677_v21, %v1570_v42  ;;  %v691_v40 = vsel %vm612_vm3, %v674_v20, %v443_v41 }
  0xeb   : > { %v546_v13 = vpop.permute.xlu0 %545  ;;  %v548_v14 = vpop.permute.xlu1 %547 }
  0xec   : > { %v557_v16 = vsel %vm426_vm0, %v1665_v63, %v546_v13  ;;  %v558_v27 = vsel %vm426_vm0, %v546_v13, %v548_v14 }
  0xed   : > { %v710_v22 = vsel %vm629_vm4, %v689_v17, %v558_v27  ;;  %v707_v25 = vsel %vm629_vm4, %v687_v18, %v557_v16 }
  0xee   : > { %853 = vmatprep.subr.bf16.mxu0 %v710_v22 }
  0xef   : > { %v550_v28 = vpop.permute.xlu0 %549  ;;  %854 = vmatpush1.bf16.msra.mxu0 %v707_v25  ;;  %v552_v63 = vpop.permute.xlu1 %551 }
  0xf0   : > { %v559_v34 = vsel %vm426_vm0, %v548_v14, %v550_v28  ;;  %v560_v36 = vsel %vm426_vm0, %v550_v28, %v552_v63 }
  0xf1   : > { %v716_v35 = vsel %vm629_vm4, %v693_v31, %v560_v36  ;;  %v713_v39 = vsel %vm629_vm4, %v691_v40, %v559_v34  ;;  %v1372_v31 = vmov (!%p1254_p7), 0.0  }
  0xf2   : > { %896 = vmatprep.subr.bf16.mxu1 %v716_v35  ;;  %957 = vst [vmem:[#allocation2] sm:$0xff] (!%p1254_p7), %v1372_v31  ;;  %958 = vst [vmem:[#allocation2 + $0x8] sm:$0xff] (!%p1254_p7), %v1372_v31 }
  0xf3   : > { %v572_v43 = vpop.permute.xlu0 %571  ;;  %897 = vmatpush1.bf16.msra.mxu1 %v713_v39  ;;  %v574_v46 = vpop.permute.xlu1 %573  ;;  %959 = vst [vmem:[#allocation2 + $0x10] sm:$0xff] (!%p1254_p7), %v1372_v31  ;;  %960 = vst [vmem:[#allocation2 + $0x18] sm:$0xff] (!%p1254_p7), %v1372_v31 }
  0xf4   : > { %v583_v30 = vsel %vm462_vm1, %v1692_v24, %v572_v43  ;;  %v584_v47 = vsel %vm462_vm1, %v572_v43, %v574_v46  ;;  %961 = vst [vmem:[#allocation2 + $0x20] sm:$0xff] (!%p1254_p7), %v1372_v31  ;;  %962 = vst [vmem:[#allocation2 + $0x28] sm:$0xff] (!%p1254_p7), %v1372_v31 }
  0xf5   : > { %v754_v29 = vsel %vm587_vm2, %v583_v30, 0  ;;  %1250 = vmatprep.subr.msk.bf16.mxu0 %vm587_vm2, %v584_v47  ;;  %963 = vst [vmem:[#allocation2 + $0x30] sm:$0xff] (!%p1254_p7), %v1372_v31  ;;  %964 = vst [vmem:[#allocation2 + $0x38] sm:$0xff] (!%p1254_p7), %v1372_v31 }
  0xf6   : > { %856 = vmatpush1.bf16.msra.mxu0 %v754_v29  ;;  %965 = vst [vmem:[#allocation2 + $0x40] sm:$0xff] (!%p1254_p7), %v1372_v31  ;;  %966 = vst [vmem:[#allocation2 + $0x48] sm:$0xff] (!%p1254_p7), %v1372_v31 }
  0xf7   : > { %v576_v11 = vpop.permute.xlu0 %575  ;;  %v578_v41 = vpop.permute.xlu1 %577  ;;  %967 = vst [vmem:[#allocation2 + $0x50] sm:$0xff] (!%p1254_p7), %v1372_v31  ;;  %968 = vst [vmem:[#allocation2 + $0x58] sm:$0xff] (!%p1254_p7), %v1372_v31 }
  0xf8   : > { %v585_v42 = vsel %vm462_vm1, %v574_v46, %v576_v11  ;;  %v586_v48 = vsel %vm462_vm1, %v576_v11, %v578_v41  ;;  %969 = vst [vmem:[#allocation2 + $0x60] sm:$0xff] (!%p1254_p7), %v1372_v31  ;;  %970 = vst [vmem:[#allocation2 + $0x68] sm:$0xff] (!%p1254_p7), %v1372_v31 }
  0xf9   : > { %v760_v37 = vsel %vm587_vm2, %v585_v42, 0  ;;  %1252 = vmatprep.subr.msk.bf16.mxu1 %vm587_vm2, %v586_v48  ;;  %1251 = vmatmul.mubr.msk.bf16.vlgmr.msra.gmra.mrb[4].mxu0 %vm737_vm5, %v1690_v19  ;;  %971 = vst [vmem:[#allocation2 + $0x70] sm:$0xff] (!%p1254_p7), %v1372_v31  ;;  %972 = vst [vmem:[#allocation2 + $0x78] sm:$0xff] (!%p1254_p7), %v1372_v31 }
  0xfa   : > { %899 = vmatpush1.bf16.msra.mxu1 %v760_v37 }
  0xfd   : > { %1253 = vmatmul.mubr.msk.bf16.vlgmr.msra.gmra.mrb[4].mxu1 %vm737_vm5, %v1690_v19 }
 0x108   : > { %v725_v24 = vpop.permute.xlu0 %724  ;;  %v730_v51 = vpop.permute.xlu1 %729 }
 0x19c   : > { %v799_v49 = vpop.f32.mrb[0].mxu0 }
 0x19d   : > { %v801_v50 = vpop.f32.mrb[1].mxu0  ;;  %v1785_v53 = vadd.f32 %v799_v49, %v725_v24 }
 0x19e   : > { %v803_v8 = vpop.f32.mrb[2].mxu0  ;;  %v1787_v54 = vadd.f32 %v801_v50, %v725_v24 }
 0x19f   : > { %v937_v55 = vmax.f32 %v1785_v53, 0.0  ;;  %v805_v52 = vpop.f32.mrb[3].mxu0  ;;  %v1790_v56 = vadd.f32 %v803_v8, %v730_v51 }
 0x1a0   : > { %v842_v57 = vpop.f32.mrb[0].mxu1  ;;  %v938_v58 = vmax.f32 %v1787_v54, 0.0  ;;  %v1793_v59 = vadd.f32 %v805_v52, %v730_v51 }
 0x1a1   : > { %v844_v19 = vpop.f32.mrb[1].mxu1  ;;  %v843_v33 = vadd.f32 %v842_v57, %v725_v24  ;;  %v945_v26 = vmax.f32 %v1790_v56, 0.0 }
 0x1a2   : > { %v846_v32 = vpop.f32.mrb[2].mxu1  ;;  %v1796_v60 = vadd.f32 %v844_v19, %v725_v24  ;;  %v946_v61 = vmax.f32 %v1793_v59, 0.0 }
 0x1a3   : > { %v939_v62 = vmax.f32 %v843_v33, 0.0  ;;  %v848_v0 = vpop.f32.mrb[3].mxu1  ;;  %v1799_v1 = vadd.f32 %v846_v32, %v730_v51 }
 0x1a4   : > { %v940_v23 = vmax.f32 %v1796_v60, 0.0  ;;  %v1802_v2 = vadd.f32 %v848_v0, %v730_v51 }
 0x1a5   : > { %v947_v3 = vmax.f32 %v1799_v1, 0.0 }
 0x1a6   : > { %v948_v4 = vmax.f32 %v1802_v2, 0.0 }
 0x1cc   : > { %v885_v5 = vpop.f32.mrb[4].mxu0 }
 0x1cd   : > { %v886_v6 = vadd.f32 %v885_v5, %v725_v24  ;;  %v887_v45 = vpop.f32.mrb[5].mxu0 }
 0x1ce   : > { %v888_v44 = vadd.f32 %v887_v45, %v725_v24  ;;  %v889_v7 = vpop.f32.mrb[6].mxu0 }
 0x1cf   : > { %v941_v9 = vmax.f32 %v886_v6, 0.0  ;;  %v1806_v10 = vadd.f32 %v889_v7, %v730_v51  ;;  %v891_v12 = vpop.f32.mrb[7].mxu0 }
 0x1d0   : > { %v942_v15 = vmax.f32 %v888_v44, 0.0  ;;  %v1808_v38 = vadd.f32 %v891_v12, %v730_v51  ;;  %v928_v13 = vpop.f32.mrb[4].mxu1  ;;  %956 = sbr.rel (%p1254_p7) target bundleno = 471 (0x1d7), region = 40 }
 0x1d1   : > { %v949_v14 = vmax.f32 %v1806_v10, 0.0  ;;  %v929_v16 = vadd.f32 %v928_v13, %v725_v24  ;;  %v930_v27 = vpop.f32.mrb[5].mxu1 }
 0x1d2   : > { %v950_v17 = vmax.f32 %v1808_v38, 0.0  ;;  %v931_v18 = vadd.f32 %v930_v27, %v725_v24  ;;  %v932_v20 = vpop.f32.mrb[6].mxu1 }
 0x1d3   : > { %v943_v21 = vmax.f32 %v929_v16, 0.0  ;;  %v1812_v22 = vadd.f32 %v932_v20, %v730_v51  ;;  %v934_v25 = vpop.f32.mrb[7].mxu1 }
 0x1d4   : > { %v944_v28 = vmax.f32 %v931_v18, 0.0  ;;  %v1814_v63 = vadd.f32 %v934_v25, %v730_v51 }
 0x1d5   : > { %v951_v34 = vmax.f32 %v1812_v22, 0.0 }
 0x1d6   : > { %v952_v36 = vmax.f32 %v1814_v63, 0.0 }
 0x1d7 PF: > { %v973_v40 = vld [vmem:[#allocation2] sm:$0xff]  ;;  %v974_v35 = vld [vmem:[#allocation2 + $0x8] sm:$0xff]  ;;  %v975_v39 = vld [vmem:[#allocation2 + $0x10] sm:$0xff]  ;;  %p1255_p8 = scmp.ne.s32.totalorder %s1350_s15, 2 }
 0x1d8   : > { %v989_v43 = vadd.f32 %v973_v40, %v937_v55  ;;  %v990_v46 = vadd.f32 %v974_v35, %v938_v58  ;;  %v991_v30 = vadd.f32 %v975_v39, %v939_v62  ;;  %v976_v47 = vld [vmem:[#allocation2 + $0x18] sm:$0xff]  ;;  %v977_v29 = vld [vmem:[#allocation2 + $0x20] sm:$0xff]  ;;  %v978_v11 = vld [vmem:[#allocation2 + $0x28] sm:$0xff] }
 0x1d9   : > { %v992_v41 = vadd.f32 %v976_v47, %v940_v23  ;;  %v993_v42 = vadd.f32 %v977_v29, %v941_v9  ;;  %v994_v48 = vadd.f32 %v978_v11, %v942_v15  ;;  %v979_v37 = vld [vmem:[#allocation2 + $0x30] sm:$0xff]  ;;  %v980_v24 = vld [vmem:[#allocation2 + $0x38] sm:$0xff]  ;;  %v981_v49 = vld [vmem:[#allocation2 + $0x40] sm:$0xff] }
 0x1da   : > { %1005 = vst [vmem:[#allocation2] sm:$0xff] %v989_v43  ;;  %1006 = vst [vmem:[#allocation2 + $0x8] sm:$0xff] %v990_v46  ;;  %v995_v51 = vadd.f32 %v979_v37, %v943_v21  ;;  %v996_v50 = vadd.f32 %v980_v24, %v944_v28  ;;  %v997_v53 = vadd.f32 %v981_v49, %v945_v26  ;;  %v982_v8 = vld [vmem:[#allocation2 + $0x48] sm:$0xff]  ;;  %v983_v54 = vld [vmem:[#allocation2 + $0x50] sm:$0xff] }
 0x1db   : > { %1007 = vst [vmem:[#allocation2 + $0x10] sm:$0xff] %v991_v30  ;;  %v984_v55 = vld [vmem:[#allocation2 + $0x58] sm:$0xff]  ;;  %1008 = vst [vmem:[#allocation2 + $0x18] sm:$0xff] %v992_v41  ;;  %v998_v52 = vadd.f32 %v982_v8, %v946_v61  ;;  %v999_v57 = vadd.f32 %v983_v54, %v947_v3  ;;  %v985_v19 = vld [vmem:[#allocation2 + $0x60] sm:$0xff]  ;;  %1024 = sbr.rel (%p1255_p8) target bundleno = 495 (0x1ef), region = 44 }
 0x1dc   : > { %1009 = vst [vmem:[#allocation2 + $0x20] sm:$0xff] %v993_v42  ;;  %1010 = vst [vmem:[#allocation2 + $0x28] sm:$0xff] %v994_v48  ;;  %v1000_v58 = vadd.f32 %v984_v55, %v948_v4  ;;  %v986_v33 = vld [vmem:[#allocation2 + $0x68] sm:$0xff]  ;;  %v987_v32 = vld [vmem:[#allocation2 + $0x70] sm:$0xff]  ;;  %v1001_v56 = vadd.f32 %v985_v19, %v949_v14 }
 0x1dd   : > { %1011 = vst [vmem:[#allocation2 + $0x30] sm:$0xff] %v995_v51  ;;  %1012 = vst [vmem:[#allocation2 + $0x38] sm:$0xff] %v996_v50  ;;  %v1002_v26 = vadd.f32 %v986_v33, %v950_v17  ;;  %v1003_v59 = vadd.f32 %v987_v32, %v951_v34  ;;  %v988_v60 = vld [vmem:[#allocation2 + $0x78] sm:$0xff] }
 0x1de   : > { %1013 = vst [vmem:[#allocation2 + $0x40] sm:$0xff] %v997_v53  ;;  %1014 = vst [vmem:[#allocation2 + $0x48] sm:$0xff] %v998_v52  ;;  %v1004_v61 = vadd.f32 %v988_v60, %v952_v36 }
 0x1df   : > { %1015 = vst [vmem:[#allocation2 + $0x50] sm:$0xff] %v999_v57  ;;  %1016 = vst [vmem:[#allocation2 + $0x58] sm:$0xff] %v1000_v58 }
 0x1e0   : > { %1017 = vst [vmem:[#allocation2 + $0x60] sm:$0xff] %v1001_v56  ;;  %1018 = vst [vmem:[#allocation2 + $0x68] sm:$0xff] %v1002_v26 }
 0x1e1   : > { %1019 = vst [vmem:[#allocation2 + $0x70] sm:$0xff] %v1003_v59  ;;  %1020 = vst [vmem:[#allocation2 + $0x78] sm:$0xff] %v1004_v61  ;;  %v1025_v62 = vld [vmem:[#allocation2] sm:$0xff] (!%p1255_p8)  ;;  %v1026_v0 = vld [vmem:[#allocation2 + $0x8] sm:$0xff] (!%p1255_p8) }
 0x1e2   : > { %v1027_v1 = vld [vmem:[#allocation2 + $0x10] sm:$0xff]  ;;  %v1041_v23 = vmul.f32 0.33333334, %v1025_v62  ;;  %v1042_v2 = vmul.f32 0.33333334, %v1026_v0  ;;  %v1028_v3 = vld [vmem:[#allocation2 + $0x18] sm:$0xff] }
 0x1e3   : > { %v1029_v4 = vld [vmem:[#allocation2 + $0x20] sm:$0xff]  ;;  %v1043_v5 = vmul.f32 0.33333334, %v1027_v1  ;;  %v1044_v6 = vmul.f32 0.33333334, %v1028_v3  ;;  %v1030_v45 = vld [vmem:[#allocation2 + $0x28] sm:$0xff] }
 0x1e4   : > { %v1031_v44 = vld [vmem:[#allocation2 + $0x30] sm:$0xff]  ;;  %v1267_v7 = vpack.c.bf16 %v1042_v2, %v1041_v23  ;;  %v1045_v9 = vmul.f32 0.33333334, %v1029_v4  ;;  %v1046_v10 = vmul.f32 0.33333334, %v1030_v45  ;;  %v1032_v12 = vld [vmem:[#allocation2 + $0x38] sm:$0xff] }
 0x1e5   : > { %v1033_v15 = vld [vmem:[#allocation2 + $0x40] sm:$0xff]  ;;  %v1268_v38 = vpack.c.bf16 %v1044_v6, %v1043_v5  ;;  %v1047_v13 = vmul.f32 0.33333334, %v1031_v44  ;;  %v1048_v14 = vmul.f32 0.33333334, %v1032_v12  ;;  %v1034_v16 = vld [vmem:[#allocation2 + $0x48] sm:$0xff] }
 0x1e6   : > { %v1035_v27 = vld [vmem:[#allocation2 + $0x50] sm:$0xff]  ;;  %1105 = vst [vmem:[%s1435_s28] sm:$0xff] %v1267_v7  ;;  %v1269_v17 = vpack.c.bf16 %v1046_v10, %v1045_v9  ;;  %v1049_v18 = vmul.f32 0.33333334, %v1033_v15  ;;  %v1050_v20 = vmul.f32 0.33333334, %v1034_v16  ;;  %v1036_v21 = vld [vmem:[#allocation2 + $0x58] sm:$0xff] }
 0x1e7   : > { %v1037_v22 = vld [vmem:[#allocation2 + $0x60] sm:$0xff]  ;;  %1106 = vst [vmem:[%s1435_s28 + $0x8] sm:$0xff] %v1268_v38  ;;  %v1270_v25 = vpack.c.bf16 %v1048_v14, %v1047_v13  ;;  %v1051_v28 = vmul.f32 0.33333334, %v1035_v27  ;;  %v1052_v63 = vmul.f32 0.33333334, %v1036_v21 }
 0x1e8   : > { %v1038_v34 = vld [vmem:[#allocation2 + $0x68] sm:$0xff]  ;;  %v1039_v36 = vld [vmem:[#allocation2 + $0x70] sm:$0xff]  ;;  %1107 = vst [vmem:[%s1435_s28 + $0x10] sm:$0xff] %v1269_v17  ;;  %v1271_v31 = vpack.c.bf16 %v1050_v20, %v1049_v18  ;;  %v1053_v40 = vmul.f32 0.33333334, %v1037_v22  ;;  %v1040_v39 = vld [vmem:[#allocation2 + $0x78] sm:$0xff] }
 0x1e9   : > { %v1054_v35 = vmul.f32 0.33333334, %v1038_v34  ;;  %1108 = vst [vmem:[%s1435_s28 + $0x18] sm:$0xff] %v1270_v25  ;;  %v1272_v43 = vpack.c.bf16 %v1052_v63, %v1051_v28  ;;  %v1055_v46 = vmul.f32 0.33333334, %v1039_v36 }
 0x1ea   : > { %v1056_v30 = vmul.f32 0.33333334, %v1040_v39  ;;  %1109 = vst [vmem:[%s1435_s28 + $0x20] sm:$0xff] %v1271_v31 }
 0x1eb   : > { %v1273_v47 = vpack.c.bf16 %v1054_v35, %v1053_v40  ;;  %1110 = vst [vmem:[%s1435_s28 + $0x28] sm:$0xff] %v1272_v43 }
 0x1ec   : > { %v1274_v29 = vpack.c.bf16 %v1056_v30, %v1055_v46 }
 0x1ed   : > { %1111 = vst [vmem:[%s1435_s28 + $0x30] sm:$0xff] %v1273_v47 }
 0x1ee   : > { %1112 = vst [vmem:[%s1435_s28 + $0x38] sm:$0xff] %v1274_v29 }
 0x1ef PF: > { %s14_s19 = sadd.s32 1, %s1366_s19   ;;  %s1866_s15 = smov %s1358_s17 }
 0x1f0   : > { %p11_p9 = scmp.ge.s32.totalorder %s14_s19, 8   ;;  %s1867_s16 = smov %s1362_s18 }
 0x1f1   : > { %s1868_s17 = smov %s1871_s20  ;;  %s1869_s18 = smov %s1875_s21 }
 0x1f2   :  { %13 = sbr.rel (!%p11_p9) target bundleno = 3 (0x3), region = 77 }

// kernel: model_forward.5
= control target key start
LH: loop header
LB: loop body
LE: loop exit
PB: predicated region body
PF: predicated region fallthrough
CT: control target
= control target key end

     0   :  { %s1782_s21 = smov 0   ;;  %s1784_s22 = smov 0   ;;  %s2538_s0 = inlined_call_operand.vmem [shape: bf16[1,1,6,1536], index: 0, kind: input, shape index: {}, may-alias: {0,2}]   ;;  %s2539_s1 = inlined_call_operand.vmem [shape: bf16[2,1,8,1536], index: 1, kind: input, shape index: {}, may-alias: {1,3}]   ;;  %s2540_s2 = inlined_call_operand.vmem [shape: bf16[1,1,6,1536], index: 2, kind: input, shape index: {}, may-alias: {0,2}]   ;;  %s2541_s3 = inlined_call_operand.vmem [shape: bf16[2,1,8,1536], index: 3, kind: input, shape index: {}, may-alias: {1,3}]   ;;  %s2542_s4 = inlined_call_operand.vmem [shape: bf16[8,126], index: 4, kind: input, shape index: {}]   ;;  %s2543_s5 = inlined_call_operand.vmem [shape: f32[8,1], index: 5, kind: input, shape index: {}]   ;;  %s2544_s6 = inlined_call_operand.vmem [shape: f32[2,8,1024], index: 6, kind: output, shape index: {}]  }
   0x1   :  { %s1786_s23 = smov 0  }
   0x2 LB: > { %s35_s24 = sadd.s32 1, %s1738_s22  ;;  %p1625_p0 = scmp.ge.s32.totalorder %s1742_s23, 1  ;;  %s1742_s23 = sphi %s1786_s23, %s16_s23   ;;  %s1738_s22 = sphi %s1784_s22, %s2546_s22   ;;  %s1734_s21 = sphi %s1782_s21, %s2545_s21  }
   0x3   : > { %p37_p1 = scmp.ge.s32.totalorder %s35_s24, 2  ;;  %p311_p2 = scmp.lt.s32.totalorder %s1742_s23, 3 }
   0x5   : > { %s2548_s24 = smov (%p37_p1, %s35_s24), 0  ;;  %p312_p3 = pnand %p1625_p0, %p311_p2 }
   0x6   : > { %p399_p4 = scmp.lt.s32.totalorder (!%p312_p3), %s1734_s21, 1  ;;  %s1744_s9 = smov (!%p312_p3), 127   ;;  %v447_v10 = vld [vmem:[%s2538_s0] sm:$0x77] (!%p312_p3)  ;;  %v448_v14 = vld [vmem:[%s2538_s0 + $0x8] sm:$0x77] (!%p312_p3) }
   0x7   : > { %315 = sbr.rel (%p312_p3) target bundleno = 579 (0x243), region = 44  ;;  %v1845_v13 = vcombine.high (!%p312_p3), %v447_v10, %v447_v10  ;;  %v1857_v17 = vcombine.low (!%p312_p3), %v448_v14, %v448_v14  ;;  %v1859_v18 = vcombine.high (!%p312_p3), %v448_v14, %v448_v14  ;;  %v449_v19 = vld [vmem:[%s2538_s0 + $0x10] sm:$0x77] (!%p312_p3)  ;;  %v1871_v23 = vcombine.low (!%p312_p3), %v447_v10, %v447_v10  ;;  %s1745_s16 = smov (!%p312_p3), 126   ;;  %v1914_v38 = vld [vmem:[%s2538_s0 + $0x18] sm:$0x77] (!%p312_p3) }
   0x8   : > { %v1869_v22 = vcombine.low (!%p312_p3), %v449_v19, %v449_v19  ;;  %v1895_v31 = vcombine.high (!%p312_p3), %v449_v19, %v449_v19  ;;  %v1922_v41 = vcombine.low (!%p312_p3), %v1914_v38, %v1914_v38  ;;  %vm542_vm0 = vcmask (!%p312_p3), 1039360  }
   0x9   : > { %v516_v16 = vrot.slane (!%p312_p3), %v1845_v13, 5  ;;  %v517_v20 = vrot.slane (!%p312_p3), %v1857_v17, 5  ;;  %v518_v21 = vrot.slane (!%p312_p3), %v1859_v18, 5  ;;  %v515_v25 = vrot.slane (!%p312_p3), %v1871_v23, 5 }
   0xa   : > { %v519_v24 = vrot.slane (!%p312_p3), %v1869_v22, 5  ;;  %v552_v26 = vrot.slane (!%p312_p3), %v1845_v13, 2  ;;  %v553_v27 = vrot.slane (!%p312_p3), %v1857_v17, 2  ;;  %v554_v28 = vrot.slane (!%p312_p3), %v1859_v18, 2 }
   0xb   : > { %v555_v29 = vrot.slane (!%p312_p3), %v1869_v22, 2  ;;  %v551_v30 = vrot.slane (!%p312_p3), %v1871_v23, 2  ;;  %v631_v32 = vrot.slane (!%p312_p3), %v1857_v17, 1  ;;  %v632_v33 = vrot.slane (!%p312_p3), %v1859_v18, 1 }
   0xc   : > { %v633_v34 = vrot.slane (!%p312_p3), %v1869_v22, 1  ;;  %v634_v35 = vrot.slane (!%p312_p3), %v1895_v31, 1  ;;  %v630_v36 = vrot.slane (!%p312_p3), %v1845_v13, 1  ;;  %v674_v37 = vrot.slane (!%p312_p3), %v1859_v18, 3 }
   0xd   : > { %v675_v39 = vrot.slane (!%p312_p3), %v1869_v22, 3  ;;  %v676_v40 = vrot.slane (!%p312_p3), %v1895_v31, 3  ;;  %v677_v42 = vrot.slane (!%p312_p3), %v1922_v41, 3  ;;  %v673_v43 = vrot.slane (!%p312_p3), %v1857_v17, 3 }
   0xe   : > { %s2550_s21 = smov (!%p399_p4, %s1734_s21), 1  ;;  %v521_v59 = vrot.slane %v1922_v41, 5  ;;  %v520_v62 = vrot.slane %v1895_v31, 5  ;;  %vm925_vm1 = vcmask 1043456   ;;  %vm578_vm2 = vcmask 1031168  }
   0xf   : > { %s1667_s25 = smul.u32 48, %s2550_s21  ;;  %vm858_vm3 = vcmask 1042432   ;;  %vm883_vm4 = vcmask 1045504   ;;  %vm908_vm5 = vcmask 1040384   ;;  %vm942_vm6 = vcmask 1046528   ;;  %s1666_s7 = sshll.u32 %s2550_s21, 6 }
  0x10   : > { %vm967_vm7 = vcmask 1041408   ;;  %vm984_vm8 = vcmask 1044480   ;;  %s2519_s10 = scalar_lea.vmem %s2544_s6, %s1666_s7 }
  0x11   : > { %s1806_s28 = scalar_lea.vmem %s2539_s1, %s1667_s25  ;;  %s1665_s29 = sadd.s32 32, %s1667_s25 }
  0x12   : > { %v483_v0 = vld [vmem:[%s1806_s28 + $0x10] sm:$0xff]  ;;  %v482_v1 = vld [vmem:[%s1806_s28 + $0x8] sm:$0xff]  ;;  %v484_v2 = vld [vmem:[%s1806_s28 + $0x18] sm:$0xff]  ;;  %s432_s8 = scalar_lea.vmem %s2541_s3, %s1665_s29 }
  0x13   : > { %v1814_v3 = vcombine.high %v483_v0, %v483_v0  ;;  %v1816_v4 = vcombine.high %v482_v1, %v482_v1  ;;  %v1822_v5 = vcombine.low %v484_v2, %v484_v2  ;;  %v1824_v6 = vcombine.low %v483_v0, %v483_v0  ;;  %v485_v9 = vld [vmem:[%s432_s8] sm:$0xff]  ;;  %v1854_v15 = vld [vmem:[%s432_s8 + $0x8] ss:$0 sps:$4 sm:$0xff]  }
  0x14   : > { %v1830_v7 = vcombine.high %v484_v2, %v484_v2  ;;  %v1832_v8 = vcombine.low %v482_v1, %v482_v1  ;;  %v1841_v11 = vcombine.low %v485_v9, %v485_v9  ;;  %v1843_v12 = vcombine.high %v485_v9, %v485_v9  ;;  %v481_v44 = vld [vmem:[%s1806_s28] sm:$0xff] }
  0x15   : > { %1162 = vrot.lane.b32.xlu1 %v1814_v3, %s1744_s9  ;;  %1158 = vrot.lane.b32.xlu0 %v1816_v4, %s1744_s9  ;;  %v1644_v45 = vcombine.high %v481_v44, %v481_v44  ;;  %v1949_v48 = vrot.slane %v1816_v4, 1  ;;  %v1951_v49 = vcombine.low %v481_v44, %v481_v44  ;;  %v1958_v50 = vrot.slane %v1824_v6, 1 }
  0x16   : > { %v1946_v47 = vrot.slane %v1832_v8, 1  ;;  %v1967_v53 = vrot.slane %v1832_v8, 5  ;;  %v1974_v54 = vrot.slane %v1816_v4, 5  ;;  %v1977_v55 = vrot.slane %v1824_v6, 5 }
  0x17   : > { %v1939_v46 = vrot.slane %v1644_v45, 1  ;;  %v742_v51 = vrot.slane %v1951_v49, 1  ;;  %v1964_v52 = vrot.slane %v1644_v45, 5  ;;  %v734_v56 = vrot.slane %v1951_v49, 5 }
  0x18   : > { %v1994_v57 = vrot.slane %v1814_v3, 5  ;;  %v2005_v58 = vrot.slane %v1814_v3, 1 }
  0x19   : > { %1164 = vrot.lane.b32.xlu1 %v1822_v5, %s1744_s9  ;;  %1160 = vrot.lane.b32.xlu0 %v1824_v6, %s1744_s9 }
  0x1d   : > { %1166 = vrot.lane.b32.xlu0 %v1830_v7, %s1744_s9  ;;  %1156 = vrot.lane.b32.xlu1 %v1832_v8, %s1744_s9 }
  0x21   : > { %1168 = vrot.lane.b32.xlu0 %v1841_v11, %s1744_s9  ;;  %1170 = vrot.lane.b32.xlu1 %v1843_v12, %s1744_s9 }
  0x25   : > { %1172 = vrot.lane.b32.xlu0 %v1854_v15, %s1744_s9  ;;  %526 = vrot.lane.b32.xlu1 %v516_v16, %s1744_s9 }
  0x29   : > { %528 = vrot.lane.b32.xlu0 %v517_v20, %s1744_s9  ;;  %530 = vrot.lane.b32.xlu1 %v518_v21, %s1744_s9 }
  0x2d   : > { %532 = vrot.lane.b32.xlu0 %v519_v24, %s1744_s9  ;;  %524 = vrot.lane.b32.xlu1 %v515_v25, %s1744_s9 }
  0x31   : > { %562 = vrot.lane.b32.xlu0 %v552_v26, %s1745_s16  ;;  %564 = vrot.lane.b32.xlu1 %v553_v27, %s1745_s16 }
  0x35   : > { %566 = vrot.lane.b32.xlu0 %v554_v28, %s1745_s16  ;;  %568 = vrot.lane.b32.xlu1 %v555_v29, %s1745_s16 }
  0x39   : > { %560 = vrot.lane.b32.xlu0 %v551_v30, %s1745_s16  ;;  %606 = vrot.lane.b32.xlu1 %v1857_v17, %s1744_s9 }
  0x3d   : > { %608 = vrot.lane.b32.xlu0 %v1859_v18, %s1744_s9  ;;  %610 = vrot.lane.b32.xlu1 %v1869_v22, %s1744_s9 }
  0x41   : > { %612 = vrot.lane.b32.xlu0 %v1895_v31, %s1744_s9  ;;  %604 = vrot.lane.b32.xlu1 %v1845_v13, %s1744_s9 }
  0x45   : > { %641 = vrot.lane.b32.xlu0 %v631_v32, %s1745_s16  ;;  %643 = vrot.lane.b32.xlu1 %v632_v33, %s1745_s16 }
  0x49   : > { %645 = vrot.lane.b32.xlu0 %v633_v34, %s1745_s16  ;;  %647 = vrot.lane.b32.xlu1 %v634_v35, %s1745_s16  ;;  %v1746_v35 = vmov 0  }
  0x4a   : > { %1336 = vmatprep.mubr.bf16.mxu0 %v1746_v35  ;;  %1377 = vmatprep.mubr.bf16.mxu1 %v1746_v35 }
  0x4b   : > { %1697 = vset.pattern.permute.xlu0 %v1746_v35 }
  0x4d   : > { %639 = vrot.lane.b32.xlu0 %v630_v36, %s1745_s16  ;;  %684 = vrot.lane.b32.xlu1 %v674_v37, %s1744_s9 }
  0x51   : > { %686 = vrot.lane.b32.xlu0 %v675_v39, %s1744_s9  ;;  %688 = vrot.lane.b32.xlu1 %v676_v40, %s1744_s9  ;;  %v556_v39 = vrot.slane %v1895_v31, 2 }
  0x55   : > { %690 = vrot.lane.b32.xlu0 %v677_v42, %s1744_s9  ;;  %682 = vrot.lane.b32.xlu1 %v673_v43, %s1744_s9  ;;  %v557_v43 = vrot.slane %v1922_v41, 2 }
  0x59   : > { %710 = vrot.lane.b32.xlu0 %v1859_v18, %s1745_s16  ;;  %712 = vrot.lane.b32.xlu1 %v1869_v22, %s1745_s16 }
  0x5d   : > { %714 = vrot.lane.b32.xlu0 %v1895_v31, %s1745_s16  ;;  %716 = vrot.lane.b32.xlu1 %v1922_v41, %s1745_s16 }
  0x61   : > { %708 = vrot.lane.b32.xlu0 %v1857_v17, %s1745_s16  ;;  %753 = vrot.lane.b32.xlu1 %v1939_v46, %s1744_s9 }
  0x65   : > { %755 = vrot.lane.b32.xlu0 %v1946_v47, %s1744_s9  ;;  %757 = vrot.lane.b32.xlu1 %v1949_v48, %s1744_s9 }
  0x69   : > { %759 = vrot.lane.b32.xlu0 %v1958_v50, %s1744_s9  ;;  %751 = vrot.lane.b32.xlu1 %v742_v51, %s1744_s9 }
  0x6d   : > { %780 = vrot.lane.b32.xlu0 %v1964_v52, %s1745_s16  ;;  %782 = vrot.lane.b32.xlu1 %v1967_v53, %s1745_s16 }
  0x71   : > { %784 = vrot.lane.b32.xlu0 %v1974_v54, %s1745_s16  ;;  %786 = vrot.lane.b32.xlu1 %v1977_v55, %s1745_s16 }
  0x75   : > { %807 = vrot.lane.b32.xlu1 %v1967_v53, %s1744_s9  ;;  %778 = vrot.lane.b32.xlu0 %v734_v56, %s1745_s16 }
  0x79   : > { %811 = vrot.lane.b32.xlu1 %v1977_v55, %s1744_s9  ;;  %809 = vrot.lane.b32.xlu0 %v1974_v54, %s1744_s9 }
  0x7d   : > { %805 = vrot.lane.b32.xlu1 %v1964_v52, %s1744_s9  ;;  %813 = vrot.lane.b32.xlu0 %v1994_v57, %s1744_s9 }
  0x81   : > { %836 = vrot.lane.b32.xlu1 %v1949_v48, %s1745_s16  ;;  %834 = vrot.lane.b32.xlu0 %v1946_v47, %s1745_s16 }
  0x85   : > { %840 = vrot.lane.b32.xlu1 %v2005_v58, %s1745_s16  ;;  %838 = vrot.lane.b32.xlu0 %v1958_v50, %s1745_s16 }
  0x87   : > { %v1163_v60 = vpop.permute.xlu1 %1162  ;;  %v1159_v61 = vpop.permute.xlu0 %1158 }
  0x89   : > { %832 = vrot.lane.b32.xlu0 %v1939_v46, %s1745_s16  ;;  %536 = vrot.lane.b32.xlu1 %v521_v59, %s1744_s9 }
  0x8b   : > { %v1165_v63 = vpop.permute.xlu1 %1164  ;;  %v1161_v0 = vpop.permute.xlu0 %1160 }
  0x8c   : > { %v1177_v1 = vsel %vm542_vm0, %v1163_v60, %v1165_v63  ;;  %v1175_v2 = vsel %vm542_vm0, %v1159_v61, %v1161_v0  ;;  %v1176_v9 = vsel %vm542_vm0, %v1161_v0, %v1163_v60 }
  0x8d   : > { %534 = vrot.lane.b32.xlu0 %v520_v62, %s1744_s9  ;;  %v1187_v10 = vsel %vm925_vm1, %v1816_v4, %v1175_v2  ;;  %v1190_v14 = vsel %vm925_vm1, %v1824_v6, %v1176_v9  ;;  %v1193_v24 = vsel %vm925_vm1, %v1814_v3, %v1177_v1  ;;  %v2037_v6 = vcombine.high %v1914_v38, %v1914_v38  ;;  %v1630_v3 = vld [vmem:[%s2540_s2 + $0x20] sm:$0x77] }
  0x8e   : > { %v1219_v16 = vrot.slane %v1187_v10, 1  ;;  %v1220_v19 = vrot.slane %v1190_v14, 1  ;;  %v1221_v27 = vrot.slane %v1193_v24, 1  ;;  %v2049_v33 = vcombine.low %v1630_v3, %v1630_v3 }
  0x8f   : > { %v2024_v20 = vpop.permute.xlu0 %1166  ;;  %v1157_v21 = vpop.permute.xlu1 %1156  ;;  %v522_v34 = vrot.slane %v2037_v6, 5  ;;  %v558_v44 = vrot.slane %v2037_v6, 2 }
  0x90   : > { %v1178_v25 = vsel %vm542_vm0, %v1165_v63, %v2024_v20  ;;  %v1174_v26 = vsel %vm542_vm0, %v1157_v21, %v1159_v61  ;;  %1229 = vrot.lane.b32.xlu1 %v1219_v16, %s1744_s9  ;;  %v523_v38 = vrot.slane %v2049_v33, 5  ;;  %v559_v59 = vrot.slane %v2049_v33, 2 }
  0x91   : > { %1231 = vrot.lane.b32.xlu0 %v1220_v19, %s1744_s9  ;;  %v1196_v4 = vsel %vm925_vm1, %v1822_v5, %v1178_v25  ;;  %v1184_v29 = vsel %vm925_vm1, %v1832_v8, %v1174_v26  ;;  %v2084_v16 = vcombine.high %v1630_v3, %v1630_v3 }
  0x92   : > { %v1222_v28 = vrot.slane %v1196_v4, 1  ;;  %v1218_v36 = vrot.slane %v1184_v29, 1 }
  0x93   : > { %v2044_v30 = vpop.permute.xlu0 %1168  ;;  %v2046_v32 = vpop.permute.xlu1 %1170 }
  0x94   : > { %1233 = vrot.lane.b32.xlu1 %v1221_v27, %s1744_s9  ;;  %v635_v27 = vrot.slane %v1922_v41, 1 }
  0x95   : > { %1235 = vrot.lane.b32.xlu0 %v1222_v28, %s1744_s9 }
  0x97   : > { %v2056_v8 = vpop.permute.xlu0 %1172  ;;  %v527_v37 = vpop.permute.xlu1 %526 }
  0x98   : > { %1227 = vrot.lane.b32.xlu1 %v1218_v36, %s1744_s9 }
  0x99   : > { %538 = vrot.lane.b32.xlu0 %v522_v34, %s1744_s9 }
  0x9b   : > { %v529_v40 = vpop.permute.xlu0 %528  ;;  %v531_v42 = vpop.permute.xlu1 %530 }
  0x9c   : > { %540 = vrot.lane.b32.xlu1 %v523_v38, %s1744_s9  ;;  %v544_v60 = vsel %vm542_vm0, %v527_v37, %v529_v40  ;;  %v545_v1 = vsel %vm542_vm0, %v529_v40, %v531_v42 }
  0x9d   : > { %570 = vrot.lane.b32.xlu0 %v556_v39, %s1745_s16  ;;  %v864_v0 = vsel %vm858_vm3, %v1845_v13, %v544_v60  ;;  %v867_v25 = vsel %vm858_vm3, %v1857_v17, %v545_v1  ;;  %v637_v39 = vrot.slane %v2049_v33, 1  ;;  %v679_v60 = vrot.slane %v2049_v33, 3 }
  0x9f   : > { %v2066_v45 = vpop.permute.xlu0 %532  ;;  %v525_v51 = vpop.permute.xlu1 %524 }
  0xa0   : > { %572 = vrot.lane.b32.xlu1 %v557_v43, %s1745_s16  ;;  %v546_v2 = vsel %vm542_vm0, %v531_v42, %v2066_v45  ;;  %v543_v26 = vsel %vm542_vm0, %v525_v51, %v527_v37  ;;  %v636_v37 = vrot.slane %v2037_v6, 1  ;;  %v638_v43 = vrot.slane %v2084_v16, 1 }
  0xa1   : > { %574 = vrot.lane.b32.xlu0 %v558_v44, %s1745_s16  ;;  %v870_v24 = vsel %vm858_vm3, %v1859_v18, %v546_v2  ;;  %v861_v36 = vsel %vm858_vm3, %v1871_v23, %v543_v26  ;;  %v678_v44 = vrot.slane %v2037_v6, 3  ;;  %v588_v23 = vrot.slane %v1857_v17, 7 }
  0xa2   : > { %v589_v2 = vrot.slane %v1859_v18, 7 }
  0xa3   : > { %v563_v61 = vpop.permute.xlu0 %562  ;;  %v565_v62 = vpop.permute.xlu1 %564 }
  0xa4   : > { %v580_v63 = vsel %vm578_vm2, %v563_v61, %v565_v62  ;;  %576 = vrot.lane.b32.xlu1 %v559_v59, %s1745_s16 }
  0xa5   : > { %614 = vrot.lane.b32.xlu0 %v1922_v41, %s1744_s9  ;;  %v888_v9 = vsel %vm883_vm4, %v864_v0, %v580_v63  ;;  %v680_v0 = vrot.slane %v2084_v16, 3  ;;  %v912_v1 = vsel %vm908_vm5, %v580_v63, %v588_v23 }
  0xa6   : > { %1304 = vmatprep.subr.bf16.mxu0 %v888_v9  ;;  %v590_v9 = vrot.slane %v1869_v22, 7 }
  0xa7   : > { %v567_v10 = vpop.permute.xlu0 %566  ;;  %v2082_v14 = vpop.permute.xlu1 %568 }
  0xa8   : > { %v581_v19 = vsel %vm578_vm2, %v565_v62, %v567_v10  ;;  %v582_v21 = vsel %vm578_vm2, %v567_v10, %v2082_v14  ;;  %616 = vrot.lane.b32.xlu1 %v2037_v6, %s1744_s9 }
  0xa9   : > { %618 = vrot.lane.b32.xlu0 %v2049_v33, %s1744_s9  ;;  %v894_v4 = vsel %vm883_vm4, %v870_v24, %v582_v21  ;;  %v891_v3 = vsel %vm883_vm4, %v867_v25, %v581_v19 }
  0xaa   : > { %1345 = vmatprep.subr.bf16.mxu1 %v894_v4 }
  0xab   : > { %v561_v28 = vpop.permute.xlu0 %560  ;;  %1346 = vmatpush1.bf16.msra.mxu1 %v891_v3  ;;  %v607_v29 = vpop.permute.xlu1 %606 }
  0xac   : > { %v579_v34 = vsel %vm578_vm2, %v561_v28, %v563_v61  ;;  %620 = vrot.lane.b32.xlu1 %v2084_v16, %s1744_s9  ;;  %v1719_v61 = vld [vmem:[%s2540_s2 + $0x28] ss:$0 sps:$4 sm:$0x77]   ;;  %v914_v28 = vsel %vm908_vm5, %v581_v19, %v589_v2 }
  0xad   : > { %649 = vrot.lane.b32.xlu0 %v635_v27, %s1745_s16  ;;  %v885_v38 = vsel %vm883_vm4, %v861_v36, %v579_v34  ;;  %v681_v4 = vrot.slane %v1719_v61, 3  ;;  %v916_v36 = vsel %vm908_vm5, %v582_v21, %v590_v9  ;;  %v668_v9 = vrot.slane %v1895_v31, 6 }
  0xae   : > { %1305 = vmatpush1.bf16.msra.mxu0 %v885_v38 }
  0xaf   : > { %v609_v40 = vpop.permute.xlu0 %608  ;;  %v611_v42 = vpop.permute.xlu1 %610 }
  0xb0   : > { %651 = vrot.lane.b32.xlu1 %v636_v37, %s1745_s16  ;;  %v623_v62 = vsel %vm542_vm0, %v607_v29, %v609_v40  ;;  %v624_v3 = vsel %vm542_vm0, %v609_v40, %v611_v42  ;;  %v587_v37 = vrot.slane %v1845_v13, 7 }
  0xb1   : > { %653 = vrot.lane.b32.xlu0 %v637_v39, %s1745_s16  ;;  %v929_v26 = vsel %vm925_vm1, %v912_v1, %v623_v62 }
  0xb2   : > { %v910_v23 = vsel %vm908_vm5, %v579_v34, %v587_v37 }
  0xb3   : > { %v2115_v51 = vpop.permute.xlu0 %612  ;;  %v605_v59 = vpop.permute.xlu1 %604 }
  0xb4   : > { %655 = vrot.lane.b32.xlu1 %v638_v43, %s1745_s16  ;;  %v625_v27 = vsel %vm542_vm0, %v611_v42, %v2115_v51  ;;  %v622_v19 = vsel %vm542_vm0, %v605_v59, %v607_v29  ;;  %v666_v59 = vrot.slane %v1859_v18, 6  ;;  %v2166_v18 = vrot.slane %v1822_v5, 1 }
  0xb5   : > { %692 = vrot.lane.b32.xlu0 %v678_v44, %s1744_s9  ;;  %v933_v42 = vsel %vm925_vm1, %v916_v36, %v625_v27  ;;  %v931_v44 = vsel %vm925_vm1, %v914_v28, %v624_v3  ;;  %v927_v29 = vsel %vm925_vm1, %v910_v23, %v622_v19  ;;  %v2173_v3 = vrot.slane %v1830_v7, 1 }
  0xb6   : > { %v667_v27 = vrot.slane %v1869_v22, 6  ;;  %v2180_v28 = vrot.slane %v1841_v11, 1 }
  0xb7   : > { %v642_v10 = vpop.permute.xlu0 %641  ;;  %v644_v24 = vpop.permute.xlu1 %643 }
  0xb8   : > { %v658_v25 = vsel %vm578_vm2, %v642_v10, %v644_v24  ;;  %694 = vrot.lane.b32.xlu1 %v679_v60, %s1744_s9 }
  0xb9   : > { %696 = vrot.lane.b32.xlu0 %v680_v0, %s1744_s9  ;;  %v947_v63 = vsel %vm942_vm6, %v929_v26, %v658_v25  ;;  %v665_v26 = vrot.slane %v1857_v17, 6 }
  0xba   : > { %1306 = vmatprep.subr.bf16.mxu0 %v947_v63 }
  0xbb   : > { %v646_v38 = vpop.permute.xlu0 %645  ;;  %v2139_v39 = vpop.permute.xlu1 %647 }
  0xbc   : > { %v659_v43 = vsel %vm578_vm2, %v644_v24, %v646_v38  ;;  %v660_v40 = vsel %vm578_vm2, %v646_v38, %v2139_v39  ;;  %698 = vrot.lane.b32.xlu1 %v681_v4, %s1744_s9  ;;  %v971_v24 = vsel %vm967_vm7, %v658_v25, %v666_v59 }
  0xbd   : > { %718 = vrot.lane.b32.xlu0 %v2037_v6, %s1745_s16  ;;  %v953_v13 = vsel %vm942_vm6, %v933_v42, %v660_v40  ;;  %v950_v21 = vsel %vm942_vm6, %v931_v44, %v659_v43  ;;  %v975_v38 = vsel %vm967_vm7, %v660_v40, %v668_v9  ;;  %v973_v19 = vsel %vm967_vm7, %v659_v43, %v667_v27 }
  0xbe   : > { %1347 = vmatprep.subr.bf16.mxu1 %v953_v13  ;;  %v2198_v40 = vrot.slane %v1822_v5, 5 }
  0xbf   : > { %v640_v60 = vpop.permute.xlu0 %639  ;;  %1348 = vmatpush1.bf16.msra.mxu1 %v950_v21  ;;  %v685_v62 = vpop.permute.xlu1 %684 }
  0xc0   : > { %v657_v0 = vsel %vm578_vm2, %v640_v60, %v642_v10  ;;  %720 = vrot.lane.b32.xlu1 %v2049_v33, %s1745_s16  ;;  %v2203_v60 = vrot.slane %v1830_v7, 5 }
  0xc1   : > { %722 = vrot.lane.b32.xlu0 %v2084_v16, %s1745_s16  ;;  %v944_v1 = vsel %vm942_vm6, %v927_v29, %v657_v0  ;;  %v969_v37 = vsel %vm967_vm7, %v657_v0, %v665_v26  ;;  %v2210_v0 = vrot.slane %v1841_v11, 5 }
  0xc2   : > { %1307 = vmatpush1.bf16.msra.mxu0 %v944_v1 }
  0xc3   : > { %v687_v34 = vpop.permute.xlu0 %686  ;;  %v689_v2 = vpop.permute.xlu1 %688 }
  0xc4   : > { %v701_v10 = vsel %vm542_vm0, %v685_v62, %v687_v34  ;;  %724 = vrot.lane.b32.xlu1 %v1719_v61, %s1745_s16  ;;  %v702_v61 = vsel %vm542_vm0, %v687_v34, %v689_v2 }
  0xc5   : > { %761 = vrot.lane.b32.xlu0 %v2005_v58, %s1744_s9  ;;  %v989_v4 = vsel %vm984_vm8, %v971_v24, %v701_v10  ;;  %v992_v13 = vsel %vm984_vm8, %v973_v19, %v702_v61  ;;  %v804_v10 = vrot.slane %v1843_v12, 5 }
  0xc6   : > { %1308 = vmatprep.subr.bf16.mxu0 %v989_v4 }
  0xc7   : > { %v2177_v63 = vpop.permute.xlu0 %690  ;;  %v683_v25 = vpop.permute.xlu1 %682 }
  0xc8   : > { %v703_v17 = vsel %vm542_vm0, %v689_v2, %v2177_v63  ;;  %v700_v36 = vsel %vm542_vm0, %v683_v25, %v685_v62  ;;  %763 = vrot.lane.b32.xlu1 %v2166_v18, %s1744_s9 }
  0xc9   : > { %765 = vrot.lane.b32.xlu0 %v2173_v3, %s1744_s9  ;;  %v986_v42 = vsel %vm984_vm8, %v969_v37, %v700_v36  ;;  %v995_v44 = vsel %vm984_vm8, %v975_v38, %v703_v17 }
  0xca   : > { %1309 = vmatpush1.bf16.msra.mxu0 %v986_v42  ;;  %1349 = vmatprep.subr.bf16.mxu1 %v995_v44  ;;  %v1179_v42 = vsel %vm542_vm0, %v2024_v20, %v2044_v30 }
  0xcb   : > { %v711_v21 = vpop.permute.xlu0 %710  ;;  %1350 = vmatpush1.bf16.msra.mxu1 %v992_v13  ;;  %v713_v23 = vpop.permute.xlu1 %712  ;;  %v1199_v20 = vsel %vm925_vm1, %v1830_v7, %v1179_v42 }
  0xcc   : > { %767 = vrot.lane.b32.xlu1 %v2180_v28, %s1744_s9  ;;  %v727_v59 = vsel %vm578_vm2, %v711_v21, %v713_v23 }
  0xcd   : > { %788 = vrot.lane.b32.xlu0 %v1994_v57, %s1745_s16  ;;  %v1014_v9 = vsel %vm858_vm3, %v727_v59, %v1964_v52 }
  0xcf   : > { %v715_v43 = vpop.permute.xlu0 %714  ;;  %v2205_v62 = vpop.permute.xlu1 %716 }
  0xd0   : > { %790 = vrot.lane.b32.xlu1 %v2198_v40, %s1745_s16  ;;  %v729_v24 = vsel %vm578_vm2, %v715_v43, %v2205_v62  ;;  %v728_v27 = vsel %vm578_vm2, %v713_v23, %v715_v43  ;;  %v1180_v23 = vsel %vm542_vm0, %v2044_v30, %v2046_v32  ;;  %v1223_v30 = vrot.slane %v1199_v20, 1 }
  0xd1   : > { %792 = vrot.lane.b32.xlu0 %v2203_v60, %s1745_s16  ;;  %v1020_v38 = vsel %vm858_vm3, %v729_v24, %v1974_v54  ;;  %v1017_v13 = vsel %vm858_vm3, %v728_v27, %v1967_v53 }
  0xd3   : > { %v709_v5 = vpop.permute.xlu0 %708  ;;  %v754_v29 = vpop.permute.xlu1 %753 }
  0xd4   : > { %794 = vrot.lane.b32.xlu1 %v2210_v0, %s1745_s16  ;;  %v726_v26 = vsel %vm578_vm2, %v709_v5, %v711_v21  ;;  %v831_v5 = vrot.slane %v1843_v12, 1 }
  0xd5   : > { %815 = vrot.lane.b32.xlu0 %v2198_v40, %s1744_s9  ;;  %v1011_v37 = vsel %vm858_vm3, %v726_v26, %v734_v56 }
  0xd7   : > { %v756_v1 = vpop.permute.xlu0 %755  ;;  %v758_v34 = vpop.permute.xlu1 %757 }
  0xd8   : > { %v770_v2 = vsel %vm542_vm0, %v754_v29, %v756_v1  ;;  %817 = vrot.lane.b32.xlu1 %v2203_v60, %s1744_s9  ;;  %v771_v61 = vsel %vm542_vm0, %v756_v1, %v758_v34  ;;  %v1202_v1 = vsel %vm925_vm1, %v1841_v11, %v1180_v23 }
  0xd9   : > { %819 = vrot.lane.b32.xlu0 %v2210_v0, %s1744_s9  ;;  %v1037_v4 = vsel %vm942_vm6, %v1014_v9, %v770_v2  ;;  %v1040_v49 = vsel %vm942_vm6, %v1017_v13, %v771_v61 }
  0xda   : > { %1310 = vmatprep.subr.bf16.mxu0 %v1037_v4  ;;  %v1224_v4 = vrot.slane %v1202_v1, 1 }
  0xdb   : > { %v2233_v25 = vpop.permute.xlu0 %759  ;;  %v752_v52 = vpop.permute.xlu1 %751 }
  0xdc   : > { %v772_v17 = vsel %vm542_vm0, %v758_v34, %v2233_v25  ;;  %v769_v36 = vsel %vm542_vm0, %v752_v52, %v754_v29  ;;  %821 = vrot.lane.b32.xlu1 %v804_v10, %s1744_s9  ;;  %v1181_v29 = vsel %vm542_vm0, %v2046_v32, %v2056_v8 }
  0xdd   : > { %842 = vrot.lane.b32.xlu0 %v2166_v18, %s1745_s16  ;;  %v1034_v44 = vsel %vm942_vm6, %v1011_v37, %v769_v36  ;;  %v1043_v19 = vsel %vm942_vm6, %v1020_v38, %v772_v17  ;;  %v1205_v24 = vsel %vm925_vm1, %v1843_v12, %v1181_v29  ;;  %v1208_v37 = vsel %vm925_vm1, %v1854_v15, %v2056_v8  ;;  %v1278_v15 = vld [vmem:[%s2543_s5] sm:$0xff] }
  0xde   : > { %1311 = vmatpush1.bf16.msra.mxu0 %v1034_v44  ;;  %1351 = vmatprep.subr.bf16.mxu1 %v1043_v19  ;;  %v1225_v38 = vrot.slane %v1205_v24, 1 }
  0xdf   : > { %1352 = vmatpush1.bf16.msra.mxu1 %v1040_v49  ;;  %v781_v56 = vpop.permute.xlu0 %780  ;;  %v783_v21 = vpop.permute.xlu1 %782 }
  0xe0   : > { %v797_v43 = vsel %vm578_vm2, %v781_v56, %v783_v21  ;;  %844 = vrot.lane.b32.xlu1 %v2173_v3, %s1745_s16 }
  0xe1   : > { %846 = vrot.lane.b32.xlu0 %v2180_v28, %s1745_s16  ;;  %v1060_v7 = vsel %vm858_vm3, %v770_v2, %v797_v43 }
  0xe2   : > { %v1077_v59 = vsel %vm942_vm6, %v1060_v7, %v1946_v47 }
  0xe3   : > { %v785_v34 = vpop.permute.xlu0 %784  ;;  %v2275_v9 = vpop.permute.xlu1 %786  ;;  %1312 = vmatprep.subr.bf16.mxu0 %v1077_v59 }
  0xe4   : > { %v798_v32 = vsel %vm578_vm2, %v783_v21, %v785_v34  ;;  %v799_v26 = vsel %vm578_vm2, %v785_v34, %v2275_v9  ;;  %848 = vrot.lane.b32.xlu1 %v831_v5, %s1745_s16 }
  0xe5   : > { %1237 = vrot.lane.b32.xlu0 %v1223_v30, %s1744_s9  ;;  %v1064_v2 = vsel %vm858_vm3, %v772_v17, %v799_v26  ;;  %v1062_v11 = vsel %vm858_vm3, %v771_v61, %v798_v32  ;;  %v1226_v17 = vrot.slane %v1208_v37, 1 }
  0xe6   : > { %v1083_v27 = vsel %vm942_vm6, %v1064_v2, %v1958_v50  ;;  %v1080_v52 = vsel %vm942_vm6, %v1062_v11, %v1949_v48 }
  0xe7   : > { %1353 = vmatprep.subr.bf16.mxu1 %v1083_v27  ;;  %v808_v42 = vpop.permute.xlu1 %807  ;;  %v779_v44 = vpop.permute.xlu0 %778 }
  0xe8   : > { %v796_v19 = vsel %vm578_vm2, %v779_v44, %v781_v56  ;;  %1239 = vrot.lane.b32.xlu1 %v1224_v4, %s1744_s9  ;;  %1354 = vmatpush1.bf16.msra.mxu1 %v1080_v52 }
  0xe9   : > { %1241 = vrot.lane.b32.xlu0 %v1225_v38, %s1744_s9  ;;  %v1058_v61 = vsel %vm858_vm3, %v769_v36, %v796_v19 }
  0xea   : > { %v1074_v13 = vsel %vm942_vm6, %v1058_v61, %v1939_v46 }
  0xeb   : > { %v812_v8 = vpop.permute.xlu1 %811  ;;  %v810_v49 = vpop.permute.xlu0 %809  ;;  %1313 = vmatpush1.bf16.msra.mxu0 %v1074_v13 }
  0xec   : > { %1243 = vrot.lane.b32.xlu1 %v1226_v17, %s1744_s9  ;;  %v824_v20 = vsel %vm542_vm0, %v808_v42, %v810_v49  ;;  %v825_v29 = vsel %vm542_vm0, %v810_v49, %v812_v8 }
  0xed   : > { %1281 = vperm.xlu0 %1697, %v1278_v15   ;;  %v1100_v5 = vsel %vm858_vm3, %v1946_v47, %v824_v20  ;;  %v1102_v47 = vsel %vm858_vm3, %v1949_v48, %v825_v29 }
  0xef   : > { %v806_v56 = vpop.permute.xlu1 %805  ;;  %v2303_v21 = vpop.permute.xlu0 %813 }
  0xf0   : > { %v826_v7 = vsel %vm542_vm0, %v812_v8, %v2303_v21  ;;  %v823_v26 = vsel %vm542_vm0, %v806_v56, %v808_v42 }
  0xf1   : > { %v1104_v32 = vsel %vm858_vm3, %v1958_v50, %v826_v7  ;;  %v1098_v37 = vsel %vm858_vm3, %v1939_v46, %v823_v26 }
  0xf3   : > { %v837_v36 = vpop.permute.xlu1 %836  ;;  %v835_v23 = vpop.permute.xlu0 %834 }
  0xf4   : > { %v851_v43 = vsel %vm578_vm2, %v835_v23, %v837_v36 }
  0xf5   : > { %v1117_v59 = vsel %vm942_vm6, %v1100_v5, %v851_v43  ;;  %v1138_v19 = vsel %vm858_vm3, %v851_v43, %v1974_v54 }
  0xf6   : > { %1314 = vmatprep.subr.bf16.mxu0 %v1117_v59 }
  0xf7   : > { %v2313_v30 = vpop.permute.xlu1 %840  ;;  %v839_v1 = vpop.permute.xlu0 %838 }
  0xf8   : > { %v852_v34 = vsel %vm578_vm2, %v837_v36, %v839_v1  ;;  %v853_v24 = vsel %vm578_vm2, %v839_v1, %v2313_v30 }
  0xf9   : > { %v1123_v2 = vsel %vm942_vm6, %v1104_v32, %v853_v24  ;;  %v1120_v11 = vsel %vm942_vm6, %v1102_v47, %v852_v34  ;;  %v1140_v8 = vsel %vm858_vm3, %v853_v24, %v1994_v57  ;;  %v1139_v56 = vsel %vm858_vm3, %v852_v34, %v1977_v55 }
  0xfa   : > { %1355 = vmatprep.subr.bf16.mxu1 %v1123_v2 }
  0xfb   : > { %1356 = vmatpush1.bf16.msra.mxu1 %v1120_v11  ;;  %v833_v4 = vpop.permute.xlu0 %832  ;;  %v537_v52 = vpop.permute.xlu1 %536 }
  0xfc   : > { %v850_v27 = vsel %vm578_vm2, %v833_v4, %v835_v23 }
  0xfd   : > { %v1114_v50 = vsel %vm942_vm6, %v1098_v37, %v850_v27  ;;  %v1137_v43 = vsel %vm858_vm3, %v850_v27, %v1967_v53  ;;  %v2358_v53 = vld [vmem:[%s2542_s4] sm:$0xf] }
  0xfe   : > { %1315 = vmatpush1.bf16.msra.mxu0 %v1114_v50 }
  0xff   : > { %v535_v38 = vpop.permute.xlu0 %534 }
 0x100   : > { %v548_v1 = vsel %vm542_vm0, %v535_v38, %v537_v52  ;;  %v547_v24 = vsel %vm542_vm0, %v2066_v45, %v535_v38 }
 0x101   : > { %v876_v11 = vsel %vm858_vm3, %v1895_v31, %v548_v1  ;;  %v873_v45 = vsel %vm858_vm3, %v1869_v22, %v547_v24 }
 0x102   : > { %v1230_v48 = vpop.permute.xlu1 %1229 }
 0x103   : > { %v1232_v44 = vpop.permute.xlu0 %1231 }
 0x104   : > { %v1246_v42 = vsel %vm542_vm0, %v1230_v48, %v1232_v44 }
 0x105   : > { %v1257_v61 = vsel %vm942_vm6, %v1138_v19, %v1246_v42 }
 0x106   : > { %v1234_v17 = vpop.permute.xlu1 %1233  ;;  %1316 = vmatprep.subr.bf16.mxu0 %v1257_v61 }
 0x107   : > { %v1247_v13 = vsel %vm542_vm0, %v1232_v44, %v1234_v17  ;;  %v2334_v15 = vpop.permute.xlu0 %1235 }
 0x108   : > { %v1248_v46 = vsel %vm542_vm0, %v1234_v17, %v2334_v15  ;;  %v1260_v20 = vsel %vm942_vm6, %v1139_v56, %v1247_v13  ;;  %v1292_v7 = vsel %vm942_vm6, %v1247_v13, 0  ;;  %v592_v17 = vrot.slane %v1922_v41, 7 }
 0x109   : > { %v1263_v49 = vsel %vm942_vm6, %v1140_v8, %v1248_v46 }
 0x10a   : > { %v1228_v54 = vpop.permute.xlu1 %1227  ;;  %1357 = vmatprep.subr.bf16.mxu1 %v1263_v49 }
 0x10b   : > { %v1245_v36 = vsel %vm542_vm0, %v1228_v54, %v1230_v48  ;;  %1358 = vmatpush1.bf16.msra.mxu1 %v1260_v20  ;;  %v539_v23 = vpop.permute.xlu0 %538  ;;  %v594_v20 = vrot.slane %v2049_v33, 7 }
 0x10c   : > { %1656 = vmatprep.subr.msk.bf16.mxu1 %vm942_vm6, %v1248_v46  ;;  %v1254_v5 = vsel %vm942_vm6, %v1137_v43, %v1245_v36  ;;  %v1288_v34 = vsel %vm942_vm6, %v1245_v36, 0  ;;  %v591_v46 = vrot.slane %v1895_v31, 7 }
 0x10d   : > { %1317 = vmatpush1.bf16.msra.mxu0 %v1254_v5  ;;  %v593_v5 = vrot.slane %v2037_v6, 7 }
 0x10e   : > { %v541_v29 = vpop.permute.xlu1 %540  ;;  %1654 = vmatprep.subr.msk.bf16.mxu0 %vm942_vm6, %v1246_v42 }
 0x10f   : > { %1360 = vmatpush1.bf16.msra.mxu1 %v1292_v7  ;;  %v571_v59 = vpop.permute.xlu0 %570  ;;  %v550_v4 = vsel %vm542_vm0, %v539_v23, %v541_v29 }
 0x110   : > { %v583_v32 = vsel %vm578_vm2, %v2082_v14, %v571_v59  ;;  %v549_v14 = vsel %vm542_vm0, %v537_v52, %v539_v23  ;;  %v882_v44 = vsel %vm858_vm3, %v2037_v6, %v550_v4  ;;  %v670_v4 = vrot.slane %v2037_v6, 6 }
 0x111   : > { %1319 = vmatpush1.bf16.msra.mxu0 %v1288_v34  ;;  %v897_v37 = vsel %vm883_vm4, %v873_v45, %v583_v32  ;;  %v879_v42 = vsel %vm858_vm3, %v1922_v41, %v549_v14  ;;  %v918_v43 = vsel %vm908_vm5, %v583_v32, %v591_v46  ;;  %v669_v14 = vrot.slane %v1922_v41, 6 }
 0x112   : > { %v573_v47 = vpop.permute.xlu1 %572  ;;  %1657 = vmatmul.mubr.msk.bf16.vlgmr.msra.gmra.mrb[0].mxu1 %vm578_vm2, %v2358_v53  ;;  %v672_v6 = vrot.slane %v2084_v16, 6  ;;  %v671_v41 = vrot.slane %v2049_v33, 6 }
 0x113   : > { %v584_v26 = vsel %vm578_vm2, %v571_v59, %v573_v47  ;;  %v575_v2 = vpop.permute.xlu0 %574  ;;  %1459 = vmatprep.mubr.bf16.mxu1 %v1746_v35 }
 0x114   : > { %v900_v27 = vsel %vm883_vm4, %v876_v11, %v584_v26  ;;  %1655 = vmatmul.mubr.msk.bf16.vlgmr.msra.gmra.mrb[0].mxu0 %vm578_vm2, %v2358_v53  ;;  %v585_v50 = vsel %vm578_vm2, %v573_v47, %v575_v2  ;;  %v920_v54 = vsel %vm908_vm5, %v584_v26, %v592_v17 }
 0x115   : > { %1386 = vmatprep.subr.bf16.mxu0 %v900_v27  ;;  %1418 = vmatprep.mubr.bf16.mxu0 %v1746_v35  ;;  %v903_v19 = vsel %vm883_vm4, %v879_v42, %v585_v50  ;;  %v922_v26 = vsel %vm908_vm5, %v585_v50, %v593_v5 }
 0x116   : > { %v577_v38 = vpop.permute.xlu1 %576  ;;  %1387 = vmatpush1.bf16.msra.mxu0 %v897_v37 }
 0x117   : > { %v586_v22 = vsel %vm578_vm2, %v575_v2, %v577_v38  ;;  %v615_v48 = vpop.permute.xlu0 %614 }
 0x118   : > { %v906_v52 = vsel %vm883_vm4, %v882_v44, %v586_v22  ;;  %v626_v56 = vsel %vm542_vm0, %v2115_v51, %v615_v48  ;;  %v924_v24 = vsel %vm908_vm5, %v586_v22, %v594_v20 }
 0x119   : > { %1427 = vmatprep.subr.bf16.mxu1 %v906_v52  ;;  %v935_v59 = vsel %vm925_vm1, %v918_v43, %v626_v56 }
 0x11a   : > { %v617_v61 = vpop.permute.xlu1 %616  ;;  %1428 = vmatpush1.bf16.msra.mxu1 %v903_v19 }
 0x11b   : > { %v619_v35 = vpop.permute.xlu0 %618  ;;  %v627_v49 = vsel %vm542_vm0, %v615_v48, %v617_v61 }
 0x11c   : > { %v937_v7 = vsel %vm925_vm1, %v920_v54, %v627_v49  ;;  %v628_v34 = vsel %vm542_vm0, %v617_v61, %v619_v35 }
 0x11d   : > { %v939_v27 = vsel %vm925_vm1, %v922_v26, %v628_v34 }
 0x11e   : > { %v621_v13 = vpop.permute.xlu1 %620 }
 0x11f   : > { %v650_v8 = vpop.permute.xlu0 %649  ;;  %v629_v51 = vsel %vm542_vm0, %v619_v35, %v621_v13 }
 0x120   : > { %v661_v36 = vsel %vm578_vm2, %v2139_v39, %v650_v8  ;;  %v941_v45 = vsel %vm925_vm1, %v924_v24, %v629_v51 }
 0x121   : > { %v956_v39 = vsel %vm942_vm6, %v935_v59, %v661_v36  ;;  %v977_v52 = vsel %vm967_vm7, %v661_v36, %v669_v14 }
 0x122   : > { %v652_v23 = vpop.permute.xlu1 %651 }
 0x123   : > { %v662_v31 = vsel %vm578_vm2, %v650_v8, %v652_v23  ;;  %v654_v29 = vpop.permute.xlu0 %653 }
 0x124   : > { %v959_v1 = vsel %vm942_vm6, %v937_v7, %v662_v31  ;;  %v663_v32 = vsel %vm578_vm2, %v652_v23, %v654_v29  ;;  %v979_v42 = vsel %vm967_vm7, %v662_v31, %v670_v4 }
 0x125   : > { %1388 = vmatprep.subr.bf16.mxu0 %v959_v1  ;;  %v962_v38 = vsel %vm942_vm6, %v939_v27, %v663_v32  ;;  %v981_v16 = vsel %vm967_vm7, %v663_v32, %v671_v41 }
 0x126   : > { %v656_v47 = vpop.permute.xlu1 %655  ;;  %1389 = vmatpush1.bf16.msra.mxu0 %v956_v39 }
 0x127   : > { %v664_v2 = vsel %vm578_vm2, %v654_v29, %v656_v47  ;;  %v693_v11 = vpop.permute.xlu0 %692 }
 0x128   : > { %v965_v37 = vsel %vm942_vm6, %v941_v45, %v664_v2  ;;  %v704_v22 = vsel %vm542_vm0, %v2177_v63, %v693_v11  ;;  %v983_v46 = vsel %vm967_vm7, %v664_v2, %v672_v6 }
 0x129   : > { %1429 = vmatprep.subr.bf16.mxu1 %v965_v37  ;;  %v998_v61 = vsel %vm984_vm8, %v977_v52, %v704_v22 }
 0x12a   : > { %v695_v50 = vpop.permute.xlu1 %694  ;;  %1430 = vmatpush1.bf16.msra.mxu1 %v962_v38 }
 0x12b   : > { %v705_v48 = vsel %vm542_vm0, %v693_v11, %v695_v50  ;;  %v697_v44 = vpop.permute.xlu0 %696 }
 0x12c   : > { %v1001_v19 = vsel %vm984_vm8, %v979_v42, %v705_v48  ;;  %v706_v63 = vsel %vm542_vm0, %v695_v50, %v697_v44 }
 0x12d   : > { %1390 = vmatprep.subr.bf16.mxu0 %v1001_v19  ;;  %v1004_v33 = vsel %vm984_vm8, %v981_v16, %v706_v63 }
 0x12e   : > { %v699_v35 = vpop.permute.xlu1 %698  ;;  %1391 = vmatpush1.bf16.msra.mxu0 %v998_v61 }
 0x12f   : > { %v707_v17 = vsel %vm542_vm0, %v697_v44, %v699_v35  ;;  %v719_v13 = vpop.permute.xlu0 %718 }
 0x130   : > { %v1007_v8 = vsel %vm984_vm8, %v983_v46, %v707_v17  ;;  %v730_v23 = vsel %vm578_vm2, %v2205_v62, %v719_v13 }
 0x131   : > { %1431 = vmatprep.subr.bf16.mxu1 %v1007_v8  ;;  %v1023_v59 = vsel %vm858_vm3, %v730_v23, %v1977_v55 }
 0x132   : > { %v721_v49 = vpop.permute.xlu1 %720  ;;  %1432 = vmatpush1.bf16.msra.mxu1 %v1004_v33 }
 0x133   : > { %v723_v56 = vpop.permute.xlu0 %722  ;;  %v731_v36 = vsel %vm578_vm2, %v719_v13, %v721_v49 }
 0x134   : > { %v1026_v7 = vsel %vm858_vm3, %v731_v36, %v1994_v57  ;;  %v732_v34 = vsel %vm578_vm2, %v721_v49, %v723_v56 }
 0x135   : > { %v1029_v55 = vsel %vm858_vm3, %v732_v34, %v2198_v40 }
 0x136   : > { %v725_v54 = vpop.permute.xlu1 %724 }
 0x137   : > { %v762_v20 = vpop.permute.xlu0 %761  ;;  %v733_v51 = vsel %vm578_vm2, %v723_v56, %v725_v54 }
 0x138   : > { %v773_v43 = vsel %vm542_vm0, %v2233_v25, %v762_v20  ;;  %v1032_v57 = vsel %vm858_vm3, %v733_v51, %v2203_v60 }
 0x139   : > { %v1046_v62 = vsel %vm942_vm6, %v1023_v59, %v773_v43 }
 0x13a   : > { %v764_v5 = vpop.permute.xlu1 %763 }
 0x13b   : > { %v774_v31 = vsel %vm542_vm0, %v762_v20, %v764_v5  ;;  %v766_v29 = vpop.permute.xlu0 %765 }
 0x13c   : > { %v1049_v1 = vsel %vm942_vm6, %v1026_v7, %v774_v31  ;;  %v775_v25 = vsel %vm542_vm0, %v764_v5, %v766_v29 }
 0x13d   : > { %1392 = vmatprep.subr.bf16.mxu0 %v1049_v1  ;;  %v1052_v2 = vsel %vm942_vm6, %v1029_v55, %v775_v25 }
 0x13e   : > { %v768_v39 = vpop.permute.xlu1 %767  ;;  %1393 = vmatpush1.bf16.msra.mxu0 %v1046_v62 }
 0x13f   : > { %v776_v24 = vsel %vm542_vm0, %v766_v29, %v768_v39  ;;  %v789_v32 = vpop.permute.xlu0 %788 }
 0x140   : > { %v800_v47 = vsel %vm578_vm2, %v2275_v9, %v789_v32  ;;  %v1055_v26 = vsel %vm942_vm6, %v1032_v57, %v776_v24 }
 0x141   : > { %1433 = vmatprep.subr.bf16.mxu1 %v1055_v26  ;;  %v1066_v45 = vsel %vm858_vm3, %v773_v43, %v800_v47 }
 0x142   : > { %v791_v11 = vpop.permute.xlu1 %790  ;;  %1434 = vmatpush1.bf16.msra.mxu1 %v1052_v2  ;;  %v1086_v22 = vsel %vm942_vm6, %v1066_v45, %v2005_v58 }
 0x143   : > { %v801_v4 = vsel %vm578_vm2, %v789_v32, %v791_v11  ;;  %v793_v27 = vpop.permute.xlu0 %792 }
 0x144   : > { %v802_v14 = vsel %vm578_vm2, %v791_v11, %v793_v27  ;;  %v1068_v37 = vsel %vm858_vm3, %v774_v31, %v801_v4 }
 0x145   : > { %v1089_v38 = vsel %vm942_vm6, %v1068_v37, %v2166_v18  ;;  %v1070_v50 = vsel %vm858_vm3, %v775_v25, %v802_v14 }
 0x146   : > { %v795_v9 = vpop.permute.xlu1 %794  ;;  %1394 = vmatprep.subr.bf16.mxu0 %v1089_v38  ;;  %v1092_v41 = vsel %vm942_vm6, %v1070_v50, %v2173_v3 }
 0x147   : > { %v803_v48 = vsel %vm578_vm2, %v793_v27, %v795_v9  ;;  %v816_v44 = vpop.permute.xlu0 %815  ;;  %1395 = vmatpush1.bf16.msra.mxu0 %v1086_v22 }
 0x148   : > { %v1072_v42 = vsel %vm858_vm3, %v776_v24, %v803_v48  ;;  %v827_v17 = vsel %vm542_vm0, %v2303_v21, %v816_v44 }
 0x149   : > { %v1095_v6 = vsel %vm942_vm6, %v1072_v42, %v2180_v28  ;;  %v1106_v49 = vsel %vm858_vm3, %v2005_v58, %v827_v17 }
 0x14a   : > { %v818_v52 = vpop.permute.xlu1 %817  ;;  %1435 = vmatprep.subr.bf16.mxu1 %v1095_v6 }
 0x14b   : > { %1436 = vmatpush1.bf16.msra.mxu1 %v1092_v41  ;;  %v820_v19 = vpop.permute.xlu0 %819  ;;  %v828_v35 = vsel %vm542_vm0, %v816_v44, %v818_v52 }
 0x14c   : > { %v1108_v33 = vsel %vm858_vm3, %v2166_v18, %v828_v35  ;;  %v829_v20 = vsel %vm542_vm0, %v818_v52, %v820_v19 }
 0x14d   : > { %v1110_v58 = vsel %vm858_vm3, %v2173_v3, %v829_v20 }
 0x14e   : > { %v822_v61 = vpop.permute.xlu1 %821 }
 0x14f   : > { %v843_v63 = vpop.permute.xlu0 %842  ;;  %v830_v56 = vsel %vm542_vm0, %v820_v19, %v822_v61 }
 0x150   : > { %v854_v13 = vsel %vm578_vm2, %v2313_v30, %v843_v63  ;;  %v1112_v18 = vsel %vm858_vm3, %v2180_v28, %v830_v56 }
 0x151   : > { %v1126_v21 = vsel %vm942_vm6, %v1106_v49, %v854_v13  ;;  %v1141_v28 = vsel %vm858_vm3, %v854_v13, %v2198_v40 }
 0x152   : > { %v845_v46 = vpop.permute.xlu1 %844 }
 0x153   : > { %v855_v16 = vsel %vm578_vm2, %v843_v63, %v845_v46  ;;  %v847_v8 = vpop.permute.xlu0 %846 }
 0x154   : > { %v1129_v54 = vsel %vm942_vm6, %v1108_v33, %v855_v16  ;;  %v856_v30 = vsel %vm578_vm2, %v845_v46, %v847_v8  ;;  %v1142_v1 = vsel %vm858_vm3, %v855_v16, %v2203_v60 }
 0x155   : > { %1396 = vmatprep.subr.bf16.mxu0 %v1129_v54  ;;  %v1132_v31 = vsel %vm942_vm6, %v1110_v58, %v856_v30  ;;  %v1144_v40 = vsel %vm858_vm3, %v856_v30, %v2210_v0 }
 0x156   : > { %v849_v36 = vpop.permute.xlu1 %848  ;;  %1397 = vmatpush1.bf16.msra.mxu0 %v1126_v21 }
 0x157   : > { %v857_v23 = vsel %vm578_vm2, %v847_v8, %v849_v36  ;;  %v1238_v43 = vpop.permute.xlu0 %1237 }
 0x158   : > { %v1135_v5 = vsel %vm942_vm6, %v1112_v18, %v857_v23  ;;  %v1249_v29 = vsel %vm542_vm0, %v2334_v15, %v1238_v43  ;;  %v1146_v60 = vsel %vm858_vm3, %v857_v23, %v804_v10 }
 0x159   : > { %1437 = vmatprep.subr.bf16.mxu1 %v1135_v5  ;;  %v1266_v34 = vsel %vm942_vm6, %v1141_v28, %v1249_v29  ;;  %v1296_v24 = vsel %vm942_vm6, %v1249_v29, 0 }
 0x15a   : > { %v1240_v7 = vpop.permute.xlu1 %1239  ;;  %1438 = vmatpush1.bf16.msra.mxu1 %v1132_v31 }
 0x15b   : > { %v1250_v59 = vsel %vm542_vm0, %v1238_v43, %v1240_v7  ;;  %v1242_v51 = vpop.permute.xlu0 %1241 }
 0x15c   : > { %v1269_v3 = vsel %vm942_vm6, %v1142_v1, %v1250_v59  ;;  %v1251_v62 = vsel %vm542_vm0, %v1240_v7, %v1242_v51 }
 0x15d   : > { %1398 = vmatprep.subr.bf16.mxu0 %v1269_v3  ;;  %v1272_v32 = vsel %vm942_vm6, %v1144_v40, %v1251_v62  ;;  %v1300_v57 = vsel %vm942_vm6, %v1251_v62, 0 }
 0x15e   : > { %v1244_v25 = vpop.permute.xlu1 %1243  ;;  %1399 = vmatpush1.bf16.msra.mxu0 %v1266_v34 }
 0x15f   : > { %v1252_v15 = vsel %vm542_vm0, %v1242_v51, %v1244_v25  ;;  %1658 = vmatprep.subr.msk.bf16.mxu0 %vm942_vm6, %v1250_v59 }
 0x160   : > { %v1275_v39 = vsel %vm942_vm6, %v1146_v60, %v1252_v15 }
 0x161   : > { %1439 = vmatprep.subr.bf16.mxu1 %v1275_v39 }
 0x162   : > { %1401 = vmatpush1.bf16.msra.mxu0 %v1296_v24  ;;  %1440 = vmatpush1.bf16.msra.mxu1 %v1272_v32 }
 0x163   : > { %1660 = vmatprep.subr.msk.bf16.mxu1 %vm942_vm6, %v1252_v15 }
 0x165   : > { %1659 = vmatmul.mubr.msk.bf16.vlgmr.msra.gmra.mrb[4].mxu0 %vm578_vm2, %v2358_v53 }
 0x166   : > { %1442 = vmatpush1.bf16.msra.mxu1 %v1300_v57 }
 0x169   : > { %1661 = vmatmul.mubr.msk.bf16.vlgmr.msra.gmra.mrb[4].mxu1 %vm578_vm2, %v2358_v53 }
 0x16c   : > { %v1282_v12 = vpop.permute.xlu0 %1281 }
 0x1e5   : > { %v1379_v0 = vpop.f32.mrb[0].mxu1 }
 0x1e6   : > { %v1381_v10 = vpop.f32.mrb[1].mxu1  ;;  %v1380_v55 = vadd.f32 %v1379_v0, %v1282_v12 }
 0x1e7   : > { %v1338_v47 = vpop.f32.mrb[0].mxu0  ;;  %v1383_v26 = vpop.f32.mrb[2].mxu1  ;;  %v1382_v2 = vadd.f32 %v1381_v10, %v1282_v12 }
 0x1e8   : > { %v1340_v11 = vpop.f32.mrb[1].mxu0  ;;  %v1384_v45 = vpop.f32.mrb[3].mxu1  ;;  %v1339_v53 = vadd.f32 %v1338_v47, %v1282_v12  ;;  %v1470_v4 = vmax.f32 %v1380_v55, 0.0 }
 0x1e9   : > { %v1342_v27 = vpop.f32.mrb[2].mxu0  ;;  %v1341_v14 = vadd.f32 %v1340_v11, %v1282_v12  ;;  %v1471_v37 = vmax.f32 %v1382_v2, 0.0 }
 0x1ea   : > { %v1468_v38 = vmax.f32 %v1339_v53, 0.0  ;;  %1478 = vst [vmem:[%s2519_s10 + $0x10] sm:$0xff] %v1470_v4  ;;  %v1343_v9 = vpop.f32.mrb[3].mxu0 }
 0x1eb   : > { %v1469_v22 = vmax.f32 %v1341_v14, 0.0  ;;  %1479 = vst [vmem:[%s2519_s10 + $0x18] sm:$0xff] %v1471_v37 }
 0x1ec   : > { %1476 = vst [vmem:[%s2519_s10] sm:$0xff] %v1468_v38 }
 0x1ed   : > { %1477 = vst [vmem:[%s2519_s10 + $0x8] sm:$0xff] %v1469_v22 }
 0x238   : > { %v1420_v50 = vpop.f32.mrb[4].mxu0 }
 0x239   : > { %v1421_v48 = vadd.f32 %v1420_v50, %v1282_v12  ;;  %v1422_v44 = vpop.f32.mrb[5].mxu0 }
 0x23a   : > { %v1423_v42 = vadd.f32 %v1422_v44, %v1282_v12  ;;  %v1424_v6 = vpop.f32.mrb[6].mxu0 }
 0x23b   : > { %v1472_v52 = vmax.f32 %v1421_v48, 0.0  ;;  %v1425_v41 = vpop.f32.mrb[7].mxu0 }
 0x23c   : > { %v1473_v19 = vmax.f32 %v1423_v42, 0.0  ;;  %v1461_v61 = vpop.f32.mrb[4].mxu1 }
 0x23d   : > { %1480 = vst [vmem:[%s2519_s10 + $0x20] sm:$0xff] %v1472_v52  ;;  %v1462_v63 = vadd.f32 %v1461_v61, %v1282_v12  ;;  %v1463_v35 = vpop.f32.mrb[5].mxu1 }
 0x23e   : > { %1481 = vst [vmem:[%s2519_s10 + $0x28] sm:$0xff] %v1473_v19  ;;  %v1464_v17 = vadd.f32 %v1463_v35, %v1282_v12  ;;  %v1465_v13 = vpop.f32.mrb[6].mxu1 }
 0x23f   : > { %v1474_v46 = vmax.f32 %v1462_v63, 0.0  ;;  %v1466_v16 = vpop.f32.mrb[7].mxu1 }
 0x240   : > { %v1475_v8 = vmax.f32 %v1464_v17, 0.0 }
 0x241   : > { %1482 = vst [vmem:[%s2519_s10 + $0x30] sm:$0xff] %v1474_v46 }
 0x242   : > { %1483 = vst [vmem:[%s2519_s10 + $0x38] sm:$0xff] %v1475_v8 }
 0x243 PF: > { %s16_s23 = sadd.s32 1, %s1742_s23   ;;  %s2545_s21 = smov %s1738_s22 }
 0x244   : > { %p13_p5 = scmp.ge.s32.totalorder %s16_s23, 4   ;;  %s2546_s22 = smov %s2548_s24 }
 0x246   :  { %15 = sbr.rel (!%p13_p5) target bundleno = 2 (0x2), region = 83 }

</bundles_post_ra>
